<compile_context>
chip_gen: v7x
topology: tpu7x:2x2x1
jax: 0.10.0
libtpu: 0.0.40
codegen_flags: <defaults>
</compile_context>

<pallas_src>
import jax
import jax.numpy as jnp
from jax.experimental import pallas as pl
from jax.experimental.pallas import tpu as pltpu

# Small, fixed problem sizes consistent with the module's forward.
B, C, H, W = 2, 4, 16, 16
NB = 2 * B                      # both inputs stacked -> 4 images total
HW = H * W
KK = 9                          # 3x3 taps
CONV_OUT = 8
FEAT_DIM = 32
HEAD_DIM = FEAT_DIM + 1         # feature head + 1 angle column, merged
OUT_LANES = 128                 # lane-dense output slab: feat | theta6 | pad
Hp, Wp = H + 2, W + 2           # SAME-padded spatial dims (18, 18)
L_FLAT = NB * Hp * Wp           # 1296: channel-major flattened padded pixels
P0 = Wp + 1                     # first padded flat position we compute (19)
L_Y = L_FLAT - 2 * P0           # 1258: conv output domain (padded flat coords)


# ---------------------------------------------------------------------------
# Fused Pallas kernel: conv3x3 (9 shifted matmuls) + ReLU + masked global
# average pool + merged feature/angle heads + theta assembly, for BOTH inputs.
# ---------------------------------------------------------------------------
def fused_embed_kernel(x_ref, conv_w_ref, conv_b_ref, pool_ref,
                       head_w_ref, head_b_ref, out_ref):
    # x:      (C, L_FLAT)          = (4, 1296)  channel-major, lane-dense
    # conv_w: (KK*CONV_OUT, C)     = (72, 4)    per-tap (8, 4) row blocks
    # conv_b: (CONV_OUT, 1)        = (8, 1)
    # pool:   (L_Y, NB)            = (1258, 4)  valid-pixel mean selector
    # head_w: (CONV_OUT, HEAD_DIM) = (8, 33)    [fc1_w | th_w]
    # head_b: (1, HEAD_DIM)        = (1, 33)
    # out:    (NB, OUT_LANES)      = (4, 128)
    x = x_ref[...]
    w = conv_w_ref[...]

    # 3x3 SAME conv over the padded flat domain: 9 accumulated
    # (8, C) x (C, L_Y) matmuls on statically shifted lane-dense views.
    yT = jnp.zeros((CONV_OUT, L_Y), jnp.float32)
    for dy in range(3):
        for dx in range(3):
            tap = dy * 3 + dx
            off = dy * Wp + dx                              # static 0..38
            yT = yT + jnp.dot(w[tap * CONV_OUT:(tap + 1) * CONV_OUT, :],
                              x[:, off:off + L_Y],
                              preferred_element_type=jnp.float32)
    yT = jnp.maximum(yT + conv_b_ref[...], 0.0)             # (8, L_Y)

    # Global average pool per image via one matmul with the precomputed
    # selector (junk border / cross-image positions carry weight 0).
    pooledT = jnp.dot(yT, pool_ref[...],
                      preferred_element_type=jnp.float32)   # (8, NB)

    # Merged feature + angle heads (weights pre-merged at init).
    hz = jnp.dot(pooledT.T, head_w_ref[...],
                 preferred_element_type=jnp.float32) + head_b_ref[...]  # (NB, 33)
    feat = jnp.maximum(hz[:, :FEAT_DIM], 0.0)               # (NB, 32)
    ang = hz[:, FEAT_DIM:FEAT_DIM + 1]                      # (NB, 1)
    c = jnp.cos(ang)
    s = jnp.sin(ang)

    # Lane-dense (NB, 128) output slab via zero-init + masked sub-slice
    # stores (no lane concatenates): feat in lanes 0:32, row-major 2x3 theta
    # [c, -s, 0, s, c, 0] in lanes 32:38, remaining lanes zero.
    out_ref[...] = jnp.zeros((NB, OUT_LANES), jnp.float32)
    out_ref[:, 0:FEAT_DIM] = feat
    out_ref[:, FEAT_DIM + 0:FEAT_DIM + 1] = c               # theta[0, 0]
    out_ref[:, FEAT_DIM + 1:FEAT_DIM + 2] = -s              # theta[0, 1]
    out_ref[:, FEAT_DIM + 3:FEAT_DIM + 4] = s               # theta[1, 0]
    out_ref[:, FEAT_DIM + 4:FEAT_DIM + 5] = c               # theta[1, 1]
    # lanes 34 and 37 (theta[:, 2]) stay zero from the init store.


# ---------------------------------------------------------------------------
# Wrapper glue
# ---------------------------------------------------------------------------
def rot_stn_forward(x1, x2, params):
    """Exact RotStnNet.forward semantics: ((feat0, theta0), (feat1, theta1))."""
    # Minimal preamble: stack, channel-major transpose, SAME pad, flatten.
    xs = jnp.stack([x1, x2], axis=0).astype(jnp.float32)     # (2, B, C, H, W)
    xs = xs.reshape(NB, C, H, W).transpose(1, 0, 2, 3)        # (C, NB, H, W)
    xp = jnp.pad(xs, ((0, 0), (0, 0), (1, 1), (1, 1)))        # (C, NB, Hp, Wp)
    x_flat = xp.reshape(C, L_FLAT)                            # (C, 1296)

    out = pl.pallas_call(
        fused_embed_kernel,
        out_shape=jax.ShapeDtypeStruct((NB, OUT_LANES), jnp.float32),
        in_specs=[pl.BlockSpec(memory_space=pltpu.MemorySpace.VMEM)] * 6,
        out_specs=pl.BlockSpec(memory_space=pltpu.MemorySpace.VMEM),
        cost_estimate=pl.CostEstimate(flops=807_232,
                                      transcendentals=8,
                                      bytes_accessed=45_284),
    )(x_flat, params["conv_w_k"], params["conv_b_k"], params["pool"],
      params["head_w"], params["head_b"])

    feat = out[:, :FEAT_DIM]                                  # (NB, 32)
    theta = out[:, FEAT_DIM:FEAT_DIM + 6].reshape(NB, 2, 3)   # (NB, 2, 3)
    return ((feat[:B], theta[:B]), (feat[B:], theta[B:]))


def _make_pool_matrix():
    """(L_Y, NB) selector: 1/(H*W) at each image's valid interior pixels."""
    p = jnp.arange(P0, P0 + L_Y)
    img = p // (Hp * Wp)
    rem = p % (Hp * Wp)
    hh = rem // Wp
    ww = rem % Wp
    interior = (hh >= 1) & (hh <= H) & (ww >= 1) & (ww <= W)
    sel = (img[:, None] == jnp.arange(NB)[None, :]) & interior[:, None]
    return sel.astype(jnp.float32) / float(H * W)


def init_params():
    key = jax.random.PRNGKey(42)
    k = jax.random.split(key, 6)
    conv_w = 0.1 * jax.random.normal(k[0], (KK * C, CONV_OUT), jnp.float32)
    conv_b = 0.1 * jax.random.normal(k[1], (1, CONV_OUT), jnp.float32)
    fc1_w = 0.1 * jax.random.normal(k[2], (CONV_OUT, FEAT_DIM), jnp.float32)
    fc1_b = 0.1 * jax.random.normal(k[3], (1, FEAT_DIM), jnp.float32)
    th_w = 0.1 * jax.random.normal(k[4], (CONV_OUT, 1), jnp.float32)
    th_b = 0.1 * jax.random.normal(k[5], (1, 1), jnp.float32)
    return {
        # canonical per-layer params (used by the pure-JAX reference)
        "conv_w": conv_w, "conv_b": conv_b,
        "fc1_w": fc1_w, "fc1_b": fc1_b, "th_w": th_w, "th_b": th_b,
        # kernel-layout tensors precomputed ONCE (no per-call HLO):
        "conv_w_k": conv_w.reshape(KK, C, CONV_OUT)
                          .transpose(0, 2, 1).reshape(KK * CONV_OUT, C),
        "conv_b_k": conv_b.reshape(CONV_OUT, 1),
        "head_w": jnp.concatenate([fc1_w, th_w], axis=1),     # (8, 33)
        "head_b": jnp.concatenate([fc1_b, th_b], axis=1),     # (1, 33)
        "pool": _make_pool_matrix(),                          # (1258, 4)
    }


def _reference_embed(x_nchw, params):
    """Pure-JAX reference of the same synthetic embedding net."""
    x = jnp.transpose(x_nchw, (0, 2, 3, 1)).astype(jnp.float32)
    xp = jnp.pad(x, ((0, 0), (1, 1), (1, 1), (0, 0)))
    cols = [xp[:, dy:dy + H, dx:dx + W, :] for dy in range(3) for dx in range(3)]
    patches = jnp.concatenate(cols, axis=-1).reshape(B, HW, KK * C)
    y = jnp.maximum(
        jnp.einsum("bpk,kc->bpc", patches, params["conv_w"]) + params["conv_b"], 0.0)
    h = jnp.mean(y, axis=1)
    feat = jnp.maximum(h @ params["fc1_w"] + params["fc1_b"], 0.0)
    a = (h @ params["th_w"] + params["th_b"])[:, 0]
    c, s, z = jnp.cos(a), jnp.sin(a), jnp.zeros_like(a)
    theta = jnp.stack([jnp.stack([c, -s, z], -1),
                       jnp.stack([s, c, z], -1)], axis=1)
    return feat, theta


if __name__ == "__main__":
    params = init_params()
    key = jax.random.PRNGKey(0)
    k1, k2 = jax.random.split(key)
    x1 = jax.random.normal(k1, (B, C, H, W), jnp.float32)   # NCHW, like PyTorch
    x2 = jax.random.normal(k2, (B, C, H, W), jnp.float32)

    fwd = jax.jit(rot_stn_forward)
    out = fwd(x1, x2, params)
    jax.block_until_ready(out)

    (feat0, theta0), (feat1, theta1) = out
    assert feat0.shape == (B, FEAT_DIM) and feat1.shape == (B, FEAT_DIM)
    assert theta0.shape == (B, 2, 3) and theta1.shape == (B, 2, 3)

    # Sanity-check the fused kernel against a pure-JAX reference
    # (tolerance tightened from 2e-2 per review; all-f32 path).
    rf0, rt0 = _reference_embed(x1, params)
    rf1, rt1 = _reference_embed(x2, params)
    assert jnp.allclose(feat0, rf0, rtol=1e-4, atol=1e-4)
    assert jnp.allclose(theta0, rt0, rtol=1e-4, atol=1e-4)
    assert jnp.allclose(feat1, rf1, rtol=1e-4, atol=1e-4)
    assert jnp.allclose(theta1, rt1, rtol=1e-4, atol=1e-4)

    print("KERNEL_OK")
</pallas_src>

<mosaic_0001>
module attributes {stable_mosaic.version = 11 : i64} {
  func.func @fused_embed_kernel(%arg0: memref<4x1296xf32, #tpu.memory_space<vmem>>, %arg1: memref<72x4xf32, #tpu.memory_space<vmem>>, %arg2: memref<8x1xf32, #tpu.memory_space<vmem>>, %arg3: memref<1258x4xf32, #tpu.memory_space<vmem>>, %arg4: memref<8x33xf32, #tpu.memory_space<vmem>>, %arg5: memref<1x33xf32, #tpu.memory_space<vmem>>, %arg6: memref<4x128xf32, #tpu.memory_space<vmem>>) attributes {dimension_semantics = [], scalar_prefetch = 0 : i64, scratch_operands = 0 : i64, tpu.core_type = #tpu.core_type<tc>} {
    %c0 = arith.constant 0 : index
    %c0_0 = arith.constant 0 : index
    %0 = vector.load %arg0[%c0, %c0_0] : memref<4x1296xf32, #tpu.memory_space<vmem>>, vector<4x1296xf32>
    %c0_1 = arith.constant 0 : index
    %c0_2 = arith.constant 0 : index
    %1 = vector.load %arg1[%c0_1, %c0_2] : memref<72x4xf32, #tpu.memory_space<vmem>>, vector<72x4xf32>
    %cst = arith.constant 0.000000e+00 : f32
    %2 = vector.broadcast %cst : f32 to vector<8x1258xf32>
    %3 = vector.extract_strided_slice %1 {offsets = [0, 0], sizes = [8, 4], strides = [1, 1]} : vector<72x4xf32> to vector<8x4xf32>
    %4 = vector.extract_strided_slice %0 {offsets = [0, 0], sizes = [4, 1258], strides = [1, 1]} : vector<4x1296xf32> to vector<4x1258xf32>
    %cst_3 = arith.constant dense<0.000000e+00> : vector<8x1258xf32>
    %5 = tpu.matmul %3, %4, %cst_3 {dimension_numbers = #tpu.dot_dimension_numbers<[1], [0], [0], [1], [0, 0, 1, 1], [], []>} : vector<8x4xf32>, vector<4x1258xf32>, vector<8x1258xf32> -> vector<8x1258xf32>
    %6 = arith.addf %2, %5 : vector<8x1258xf32>
    %7 = vector.extract_strided_slice %1 {offsets = [8, 0], sizes = [8, 4], strides = [1, 1]} : vector<72x4xf32> to vector<8x4xf32>
    %8 = vector.extract_strided_slice %0 {offsets = [0, 1], sizes = [4, 1258], strides = [1, 1]} : vector<4x1296xf32> to vector<4x1258xf32>
    %cst_4 = arith.constant dense<0.000000e+00> : vector<8x1258xf32>
    %9 = tpu.matmul %7, %8, %cst_4 {dimension_numbers = #tpu.dot_dimension_numbers<[1], [0], [0], [1], [0, 0, 1, 1], [], []>} : vector<8x4xf32>, vector<4x1258xf32>, vector<8x1258xf32> -> vector<8x1258xf32>
    %10 = arith.addf %6, %9 : vector<8x1258xf32>
    %11 = vector.extract_strided_slice %1 {offsets = [16, 0], sizes = [8, 4], strides = [1, 1]} : vector<72x4xf32> to vector<8x4xf32>
    %12 = vector.extract_strided_slice %0 {offsets = [0, 2], sizes = [4, 1258], strides = [1, 1]} : vector<4x1296xf32> to vector<4x1258xf32>
    %cst_5 = arith.constant dense<0.000000e+00> : vector<8x1258xf32>
    %13 = tpu.matmul %11, %12, %cst_5 {dimension_numbers = #tpu.dot_dimension_numbers<[1], [0], [0], [1], [0, 0, 1, 1], [], []>} : vector<8x4xf32>, vector<4x1258xf32>, vector<8x1258xf32> -> vector<8x1258xf32>
    %14 = arith.addf %10, %13 : vector<8x1258xf32>
    %15 = vector.extract_strided_slice %1 {offsets = [24, 0], sizes = [8, 4], strides = [1, 1]} : vector<72x4xf32> to vector<8x4xf32>
    %16 = vector.extract_strided_slice %0 {offsets = [0, 18], sizes = [4, 1258], strides = [1, 1]} : vector<4x1296xf32> to vector<4x1258xf32>
    %cst_6 = arith.constant dense<0.000000e+00> : vector<8x1258xf32>
    %17 = tpu.matmul %15, %16, %cst_6 {dimension_numbers = #tpu.dot_dimension_numbers<[1], [0], [0], [1], [0, 0, 1, 1], [], []>} : vector<8x4xf32>, vector<4x1258xf32>, vector<8x1258xf32> -> vector<8x1258xf32>
    %18 = arith.addf %14, %17 : vector<8x1258xf32>
    %19 = vector.extract_strided_slice %1 {offsets = [32, 0], sizes = [8, 4], strides = [1, 1]} : vector<72x4xf32> to vector<8x4xf32>
    %20 = vector.extract_strided_slice %0 {offsets = [0, 19], sizes = [4, 1258], strides = [1, 1]} : vector<4x1296xf32> to vector<4x1258xf32>
    %cst_7 = arith.constant dense<0.000000e+00> : vector<8x1258xf32>
    %21 = tpu.matmul %19, %20, %cst_7 {dimension_numbers = #tpu.dot_dimension_numbers<[1], [0], [0], [1], [0, 0, 1, 1], [], []>} : vector<8x4xf32>, vector<4x1258xf32>, vector<8x1258xf32> -> vector<8x1258xf32>
    %22 = arith.addf %18, %21 : vector<8x1258xf32>
    %23 = vector.extract_strided_slice %1 {offsets = [40, 0], sizes = [8, 4], strides = [1, 1]} : vector<72x4xf32> to vector<8x4xf32>
    %24 = vector.extract_strided_slice %0 {offsets = [0, 20], sizes = [4, 1258], strides = [1, 1]} : vector<4x1296xf32> to vector<4x1258xf32>
    %cst_8 = arith.constant dense<0.000000e+00> : vector<8x1258xf32>
    %25 = tpu.matmul %23, %24, %cst_8 {dimension_numbers = #tpu.dot_dimension_numbers<[1], [0], [0], [1], [0, 0, 1, 1], [], []>} : vector<8x4xf32>, vector<4x1258xf32>, vector<8x1258xf32> -> vector<8x1258xf32>
    %26 = arith.addf %22, %25 : vector<8x1258xf32>
    %27 = vector.extract_strided_slice %1 {offsets = [48, 0], sizes = [8, 4], strides = [1, 1]} : vector<72x4xf32> to vector<8x4xf32>
    %28 = vector.extract_strided_slice %0 {offsets = [0, 36], sizes = [4, 1258], strides = [1, 1]} : vector<4x1296xf32> to vector<4x1258xf32>
    %cst_9 = arith.constant dense<0.000000e+00> : vector<8x1258xf32>
    %29 = tpu.matmul %27, %28, %cst_9 {dimension_numbers = #tpu.dot_dimension_numbers<[1], [0], [0], [1], [0, 0, 1, 1], [], []>} : vector<8x4xf32>, vector<4x1258xf32>, vector<8x1258xf32> -> vector<8x1258xf32>
    %30 = arith.addf %26, %29 : vector<8x1258xf32>
    %31 = vector.extract_strided_slice %1 {offsets = [56, 0], sizes = [8, 4], strides = [1, 1]} : vector<72x4xf32> to vector<8x4xf32>
    %32 = vector.extract_strided_slice %0 {offsets = [0, 37], sizes = [4, 1258], strides = [1, 1]} : vector<4x1296xf32> to vector<4x1258xf32>
    %cst_10 = arith.constant dense<0.000000e+00> : vector<8x1258xf32>
    %33 = tpu.matmul %31, %32, %cst_10 {dimension_numbers = #tpu.dot_dimension_numbers<[1], [0], [0], [1], [0, 0, 1, 1], [], []>} : vector<8x4xf32>, vector<4x1258xf32>, vector<8x1258xf32> -> vector<8x1258xf32>
    %34 = arith.addf %30, %33 : vector<8x1258xf32>
    %35 = vector.extract_strided_slice %1 {offsets = [64, 0], sizes = [8, 4], strides = [1, 1]} : vector<72x4xf32> to vector<8x4xf32>
    %36 = vector.extract_strided_slice %0 {offsets = [0, 38], sizes = [4, 1258], strides = [1, 1]} : vector<4x1296xf32> to vector<4x1258xf32>
    %cst_11 = arith.constant dense<0.000000e+00> : vector<8x1258xf32>
    %37 = tpu.matmul %35, %36, %cst_11 {dimension_numbers = #tpu.dot_dimension_numbers<[1], [0], [0], [1], [0, 0, 1, 1], [], []>} : vector<8x4xf32>, vector<4x1258xf32>, vector<8x1258xf32> -> vector<8x1258xf32>
    %38 = arith.addf %34, %37 : vector<8x1258xf32>
    %c0_12 = arith.constant 0 : index
    %c0_13 = arith.constant 0 : index
    %39 = vector.load %arg2[%c0_12, %c0_13] : memref<8x1xf32, #tpu.memory_space<vmem>>, vector<8x1xf32>
    %40 = vector.broadcast %39 : vector<8x1xf32> to vector<8x1258xf32>
    %41 = arith.addf %38, %40 : vector<8x1258xf32>
    %cst_14 = arith.constant 0.000000e+00 : f32
    %42 = vector.broadcast %cst_14 : f32 to vector<8x1258xf32>
    %43 = arith.maximumf %41, %42 : vector<8x1258xf32>
    %c0_15 = arith.constant 0 : index
    %c0_16 = arith.constant 0 : index
    %44 = vector.load %arg3[%c0_15, %c0_16] : memref<1258x4xf32, #tpu.memory_space<vmem>>, vector<1258x4xf32>
    %cst_17 = arith.constant dense<0.000000e+00> : vector<8x4xf32>
    %45 = tpu.matmul %43, %44, %cst_17 {dimension_numbers = #tpu.dot_dimension_numbers<[1], [0], [0], [1], [0, 0, 1, 1], [], []>} : vector<8x1258xf32>, vector<1258x4xf32>, vector<8x4xf32> -> vector<8x4xf32>
    %46 = tpu.transpose %45, [1, 0] : vector<8x4xf32> -> vector<4x8xf32>
    %c0_18 = arith.constant 0 : index
    %c0_19 = arith.constant 0 : index
    %47 = vector.load %arg4[%c0_18, %c0_19] : memref<8x33xf32, #tpu.memory_space<vmem>>, vector<8x33xf32>
    %cst_20 = arith.constant dense<0.000000e+00> : vector<4x33xf32>
    %48 = tpu.matmul %46, %47, %cst_20 {dimension_numbers = #tpu.dot_dimension_numbers<[1], [0], [0], [1], [0, 0, 1, 1], [], []>} : vector<4x8xf32>, vector<8x33xf32>, vector<4x33xf32> -> vector<4x33xf32>
    %c0_21 = arith.constant 0 : index
    %c0_22 = arith.constant 0 : index
    %49 = vector.load %arg5[%c0_21, %c0_22] : memref<1x33xf32, #tpu.memory_space<vmem>>, vector<1x33xf32>
    %50 = vector.broadcast %49 : vector<1x33xf32> to vector<4x33xf32>
    %51 = arith.addf %48, %50 : vector<4x33xf32>
    %52 = vector.extract_strided_slice %51 {offsets = [0, 0], sizes = [4, 32], strides = [1, 1]} : vector<4x33xf32> to vector<4x32xf32>
    %cst_23 = arith.constant 0.000000e+00 : f32
    %53 = vector.broadcast %cst_23 : f32 to vector<4x32xf32>
    %54 = arith.maximumf %52, %53 : vector<4x32xf32>
    %55 = vector.extract_strided_slice %51 {offsets = [0, 32], sizes = [4, 1], strides = [1, 1]} : vector<4x33xf32> to vector<4x1xf32>
    %56 = math.cos %55 : vector<4x1xf32>
    %57 = math.sin %55 : vector<4x1xf32>
    %cst_24 = arith.constant 0.000000e+00 : f32
    %58 = vector.broadcast %cst_24 : f32 to vector<4x128xf32>
    %c0_25 = arith.constant 0 : index
    %c0_26 = arith.constant 0 : index
    %59 = vector.load %arg6[%c0_25, %c0_26] : memref<4x128xf32, #tpu.memory_space<vmem>>, vector<4x128xf32>
    tpu.vector_store %arg6[%c0_25, %c0_26], %58 {strides = array<i32>} : memref<4x128xf32, #tpu.memory_space<vmem>>, vector<4x128xf32>,
    %c0_27 = arith.constant 0 : index
    %c0_28 = arith.constant 0 : index
    %60 = vector.load %arg6[%c0_27, %c0_28] : memref<4x128xf32, #tpu.memory_space<vmem>>, vector<4x32xf32>
    tpu.vector_store %arg6[%c0_27, %c0_28], %54 {strides = array<i32>} : memref<4x128xf32, #tpu.memory_space<vmem>>, vector<4x32xf32>,
    %c0_29 = arith.constant 0 : index
    %c32 = arith.constant 32 : index
    %61 = vector.load %arg6[%c0_29, %c32] : memref<4x128xf32, #tpu.memory_space<vmem>>, vector<4x1xf32>
    tpu.vector_store %arg6[%c0_29, %c32], %56 {strides = array<i32>} : memref<4x128xf32, #tpu.memory_space<vmem>>, vector<4x1xf32>,
    %cst_30 = arith.constant 0.000000e+00 : f32
    %62 = vector.broadcast %cst_30 : f32 to vector<4x1xf32>
    %63 = arith.subf %62, %57 : vector<4x1xf32>
    %c0_31 = arith.constant 0 : index
    %c33 = arith.constant 33 : index
    %64 = vector.load %arg6[%c0_31, %c33] : memref<4x128xf32, #tpu.memory_space<vmem>>, vector<4x1xf32>
    tpu.vector_store %arg6[%c0_31, %c33], %63 {strides = array<i32>} : memref<4x128xf32, #tpu.memory_space<vmem>>, vector<4x1xf32>,
    %c0_32 = arith.constant 0 : index
    %c35 = arith.constant 35 : index
    %65 = vector.load %arg6[%c0_32, %c35] : memref<4x128xf32, #tpu.memory_space<vmem>>, vector<4x1xf32>
    tpu.vector_store %arg6[%c0_32, %c35], %57 {strides = array<i32>} : memref<4x128xf32, #tpu.memory_space<vmem>>, vector<4x1xf32>,
    %c0_33 = arith.constant 0 : index
    %c36 = arith.constant 36 : index
    %66 = vector.load %arg6[%c0_33, %c36] : memref<4x128xf32, #tpu.memory_space<vmem>>, vector<4x1xf32>
    tpu.vector_store %arg6[%c0_33, %c36], %56 {strides = array<i32>} : memref<4x128xf32, #tpu.memory_space<vmem>>, vector<4x1xf32>,
    return
  }
}

</mosaic_0001>

<bundles_post_ra>
// kernel: rot_stn_forward.1
= control target key start
LH: loop header
LB: loop body
LE: loop exit
PB: predicated region body
PF: predicated region fallthrough
CT: control target
= control target key end

     0   :  { %v5249_v2 = vmov 0.0   ;;  %s5250_s25 = smov 126   ;;  %vm82_vm0 = vcmask 1043456   ;;  %vm78_vm1 = vcmask 31744   ;;  %s5251_s10 = smov 110   ;;  %vm856_vm2 = vcmask 1031168   ;;  %s6539_s0 = inlined_call_operand.vmem [shape: f32[4,1296], index: 0, kind: input, shape index: {}]   ;;  %s6540_s1 = inlined_call_operand.vmem [shape: f32[72,4], index: 1, kind: input, shape index: {}]   ;;  %s6541_s2 = inlined_call_operand.vmem [shape: f32[8,1], index: 2, kind: input, shape index: {}]   ;;  %s6542_s3 = inlined_call_operand.vmem [shape: f32[1258,4], index: 3, kind: input, shape index: {}]   ;;  %s6543_s4 = inlined_call_operand.vmem [shape: f32[8,33], index: 4, kind: input, shape index: {}]   ;;  %s6544_s6 = inlined_call_operand.vmem [shape: f32[4,128], index: 6, kind: output, shape index: {}]   ;;  %s6545_s5 = inlined_call_operand.vmem [shape: f32[1,33], index: 5, kind: input, shape index: {}]  }
   0x1   :  { %v5309_v0 = vld [vmem:[%s6539_s0 + $0x8] sm:$0xff]  ;;  %v5314_v1 = vld [vmem:[%s6539_s0 + $0x10] sm:$0xff]  ;;  %545 = vmatprep.mubr.f32.mxu0 %v5249_v2  ;;  %167 = vmatprep.mubr.f32.mxu1 %v5249_v2  ;;  %v5323_v3 = vld [vmem:[%s6539_s0] sm:$0xff]  ;;  %s5252_s11 = smov 109   ;;  %s5253_s12 = smov 127   ;;  %vm1274_vm3 = vcmask 900096  }
   0x2   :  { %840 = vrot.lane.b32.xlu0 %v5309_v0, %s5250_s25  ;;  %836 = vrot.lane.b32.xlu1 %v5323_v3, %s5250_s25  ;;  %v5329_v4 = vcombine.high %v5314_v1, %v5314_v1  ;;  %v5333_v5 = vcombine.high %v5323_v3, %v5323_v3  ;;  %v5338_v6 = vld [vmem:[%s6540_s1] sm:$0xff]  ;;  %v5356_v8 = vld [vmem:[%s6539_s0 + $0x18] sm:$0xff]  ;;  %v5422_v10 = vcombine.high %v5309_v0, %v5309_v0  ;;  %s5254_s13 = smov 108   ;;  %s5255_s14 = smov 92   ;;  %vm1692_vm4 = vcmask 891904  }
   0x3   :  { %v5343_v7 = vld [vmem:[%s6539_s0 + $0x20] sm:$0xff]  ;;  %v5442_v11 = vcombine.high %v5356_v8, %v5356_v8  ;;  %v5468_v12 = vld [vmem:[%s6539_s0 + $0x28] sm:$0xf]  ;;  %s5256_s17 = smov 91   ;;  %v5502_v19 = vld [vmem:[%s6540_s1 + $0x10] sm:$0xff]  ;;  %s5257_s19 = smov 90  }
   0x4   :  { %4679 = vmatprep.subr.msk.mxu0 %vm82_vm0, %v5333_v5  ;;  %v5362_v9 = vcombine.high %v5343_v7, %v5343_v7  ;;  %v5555_v31 = vld [vmem:[%s6540_s1 + $0x18] sm:$0xff]  ;;  %v5608_v45 = vld [vmem:[%s6540_s1 + $0x20] sm:$0xff]  ;;  %vm68_vm5 = vcmask 1039360   ;;  %v5258_v55 = vmov 0   ;;  %v5646_v57 = vld [vmem:[%s6540_s1 + $0x8] sm:$0xff]  ;;  %vm2110_vm6 = vcmask 883712  }
   0x5   :  { %4680 = vmatpush1.msk.msra.mxu0 %vm82_vm0, %v5323_v3  ;;  %5238 = vset.pattern.permute.xlu1 %v5258_v55  ;;  %v3772_v58 = vld [vmem:[%s6541_s2] sm:$0xff]  ;;  %vm2531_vm7 = vcmask 752640   ;;  %vm2952_vm8 = vcmask 744448   ;;  %vm3373_vm9 = vcmask 736256   ;;  %vm3956_vm10 = vcmask 867328   ;;  %4636 = vst [vmem:[%s6544_s6] sm:$0xf] %v5249_v2 }
   0x6   :  { %838 = vrot.lane.b32.xlu0 %v5333_v5, %s5250_s25  ;;  %846 = vrot.lane.b32.xlu1 %v5329_v4, %s5250_s25  ;;  %vm3960_vm11 = vcmask 1041408   ;;  %vm5260_vm12 = vmmov 1   ;;  %vm5261_vm14 = vmmov 0   ;;  %vm4354_vm15 = vcmask 64512  }
   0x7   :  { %4681 = vmatmul.mubr.msk.f32.vlgmr.msra.gmra.mrb[0].mxu0 %vm78_vm1, %v5338_v6  ;;  %4685 = vmatprep.subr.msk.mxu0 %vm82_vm0, %v5329_v4  ;;  %vm5130_vm13 = vmpackc.low %vm3960_vm11, %vm5260_vm12  ;;  %vm4639_vm12 = vcmask 265472  }
   0x8   :  { %687 = vmatprep.mubr.f32.mxu0 %v5249_v2  ;;  %4686 = vmatpush1.msk.msra.mxu0 %vm82_vm0, %v5314_v1 }
   0x9   :  { %4691 = vmatprep.subr.msk.mxu0 %vm82_vm0, %v5362_v9 }
   0xa   :  { %848 = vrot.lane.b32.xlu0 %v5356_v8, %s5250_s25  ;;  %844 = vrot.lane.b32.xlu1 %v5314_v1, %s5250_s25 }
   0xb   :  { %4687 = vmatmul.mubr.msk.f32.vlgmr.msra.gmra.mrb[2].mxu0 %vm78_vm1, %v5338_v6 }
   0xc   :  { %4692 = vmatpush1.msk.msra.mxu0 %vm82_vm0, %v5343_v7  ;;  %829 = vmatprep.mubr.f32.mxu0 %v5249_v2 }
   0xe   :  { %852 = vrot.lane.b32.xlu0 %v5343_v7, %s5250_s25  ;;  %854 = vrot.lane.b32.xlu1 %v5362_v9, %s5250_s25 }
   0xf   :  { %4693 = vmatmul.mubr.msk.f32.vlgmr.msra.gmra.mrb[4].mxu0 %vm78_vm1, %v5338_v6 }
  0x10   :  { %953 = vmatprep.mubr.f32.mxu0 %v5249_v2 }
  0x12   :  { %1256 = vrot.lane.b32.xlu0 %v5333_v5, %s5251_s10  ;;  %1258 = vrot.lane.b32.xlu1 %v5309_v0, %s5251_s10 }
  0x16   :  { %1254 = vrot.lane.b32.xlu0 %v5323_v3, %s5251_s10  ;;  %1264 = vrot.lane.b32.xlu1 %v5329_v4, %s5251_s10 }
  0x1a   :  { %1266 = vrot.lane.b32.xlu0 %v5356_v8, %s5251_s10  ;;  %1262 = vrot.lane.b32.xlu1 %v5314_v1, %s5251_s10 }
  0x1e   :  { %1270 = vrot.lane.b32.xlu0 %v5343_v7, %s5251_s10  ;;  %1272 = vrot.lane.b32.xlu1 %v5362_v9, %s5251_s10 }
  0x22   :  { %1674 = vrot.lane.b32.xlu0 %v5333_v5, %s5252_s11  ;;  %1676 = vrot.lane.b32.xlu1 %v5309_v0, %s5252_s11 }
  0x26   :  { %1672 = vrot.lane.b32.xlu0 %v5323_v3, %s5252_s11  ;;  %1682 = vrot.lane.b32.xlu1 %v5329_v4, %s5252_s11 }
  0x2a   :  { %1684 = vrot.lane.b32.xlu0 %v5356_v8, %s5252_s11  ;;  %1680 = vrot.lane.b32.xlu1 %v5314_v1, %s5252_s11 }
  0x2e   :  { %50 = vrot.lane.b32.xlu0 %v5333_v5, %s5253_s12  ;;  %52 = vrot.lane.b32.xlu1 %v5309_v0, %s5253_s12 }
  0x32   :  { %48 = vrot.lane.b32.xlu0 %v5323_v3, %s5253_s12  ;;  %1688 = vrot.lane.b32.xlu1 %v5343_v7, %s5252_s11 }
  0x36   :  { %1690 = vrot.lane.b32.xlu0 %v5362_v9, %s5252_s11  ;;  %54 = vrot.lane.b32.xlu1 %v5422_v10, %s5253_s12 }
  0x3a   :  { %56 = vrot.lane.b32.xlu0 %v5314_v1, %s5253_s12  ;;  %2092 = vrot.lane.b32.xlu1 %v5333_v5, %s5254_s13 }
  0x3e   :  { %2094 = vrot.lane.b32.xlu0 %v5309_v0, %s5254_s13  ;;  %2090 = vrot.lane.b32.xlu1 %v5323_v3, %s5254_s13 }
  0x42   :  { %58 = vrot.lane.b32.xlu0 %v5329_v4, %s5253_s12  ;;  %60 = vrot.lane.b32.xlu1 %v5356_v8, %s5253_s12 }
  0x46   :  { %2100 = vrot.lane.b32.xlu0 %v5329_v4, %s5254_s13  ;;  %2102 = vrot.lane.b32.xlu1 %v5356_v8, %s5254_s13 }
  0x4a   :  { %2098 = vrot.lane.b32.xlu0 %v5314_v1, %s5254_s13  ;;  %62 = vrot.lane.b32.xlu1 %v5442_v11, %s5253_s12 }
  0x4e   :  { %64 = vrot.lane.b32.xlu0 %v5343_v7, %s5253_s12  ;;  %2106 = vrot.lane.b32.xlu1 %v5343_v7, %s5254_s13 }
  0x52   :  { %2108 = vrot.lane.b32.xlu0 %v5362_v9, %s5254_s13  ;;  %66 = vrot.lane.b32.xlu1 %v5362_v9, %s5253_s12 }
  0x56   :  { %2511 = vrot.lane.b32.xlu0 %v5333_v5, %s5255_s14  ;;  %2513 = vrot.lane.b32.xlu1 %v5309_v0, %s5255_s14 }
  0x5a   :  { %2509 = vrot.lane.b32.xlu0 %v5323_v3, %s5255_s14  ;;  %2519 = vrot.lane.b32.xlu1 %v5329_v4, %s5255_s14 }
  0x5e   :  { %2521 = vrot.lane.b32.xlu0 %v5356_v8, %s5255_s14  ;;  %2517 = vrot.lane.b32.xlu1 %v5314_v1, %s5255_s14 }
  0x62   :  { %2527 = vrot.lane.b32.xlu0 %v5362_v9, %s5255_s14  ;;  %2529 = vrot.lane.b32.xlu1 %v5468_v12, %s5255_s14 }
  0x66   :  { %2525 = vrot.lane.b32.xlu0 %v5343_v7, %s5255_s14  ;;  %842 = vrot.lane.b32.xlu1 %v5422_v10, %s5250_s25 }
  0x6a   :  { %2932 = vrot.lane.b32.xlu0 %v5333_v5, %s5256_s17  ;;  %2934 = vrot.lane.b32.xlu1 %v5309_v0, %s5256_s17 }
  0x6e   :  { %2930 = vrot.lane.b32.xlu0 %v5323_v3, %s5256_s17  ;;  %850 = vrot.lane.b32.xlu1 %v5442_v11, %s5250_s25 }
  0x72   :  { %2940 = vrot.lane.b32.xlu0 %v5329_v4, %s5256_s17  ;;  %2942 = vrot.lane.b32.xlu1 %v5356_v8, %s5256_s17 }
  0x74   :  { %v5490_v13 = vpop.permute.xlu0 %840  ;;  %v837_v14 = vpop.permute.xlu1 %836 }
  0x76   :  { %2938 = vrot.lane.b32.xlu0 %v5314_v1, %s5256_s17  ;;  %1260 = vrot.lane.b32.xlu1 %v5422_v10, %s5251_s10 }
  0x78   :  { %v839_v15 = vpop.permute.xlu0 %838  ;;  %v847_v16 = vpop.permute.xlu1 %846 }
  0x79   :  { %v857_v17 = vsel %vm856_vm2, %v837_v14, %v839_v15  ;;  %v858_v18 = vsel %vm856_vm2, %v839_v15, %v5490_v13  ;;  %v5680_v14 = vld [vmem:[%s6540_s1 + $0x28] sm:$0xff] }
  0x7a   :  { %2948 = vrot.lane.b32.xlu0 %v5362_v9, %s5256_s17  ;;  %4694 = vmatprep.subr.msk.mxu0 %vm82_vm0, %v858_v18 }
  0x7b   :  { %2950 = vrot.lane.b32.xlu1 %v5468_v12, %s5256_s17  ;;  %4695 = vmatpush1.msk.msra.mxu0 %vm82_vm0, %v857_v17 }
  0x7c   :  { %v5510_v20 = vpop.permute.xlu0 %848  ;;  %4696 = vmatmul.mubr.msk.f32.vlgmr.msra.gmra.mrb[0].mxu0 %vm78_vm1, %v5502_v19  ;;  %v5514_v21 = vpop.permute.xlu1 %844 }
  0x7d   :  { %v862_v22 = vsel %vm856_vm2, %v847_v16, %v5510_v20  ;;  %1095 = vmatprep.mubr.f32.mxu0 %v5249_v2  ;;  %v861_v23 = vsel %vm856_vm2, %v5514_v21, %v847_v16 }
  0x7e   :  { %2946 = vrot.lane.b32.xlu0 %v5343_v7, %s5256_s17  ;;  %4700 = vmatprep.subr.msk.mxu0 %vm82_vm0, %v862_v22 }
  0x7f   :  { %1268 = vrot.lane.b32.xlu1 %v5442_v11, %s5251_s10  ;;  %4701 = vmatpush1.msk.msra.mxu0 %vm82_vm0, %v861_v23 }
  0x80   :  { %v5527_v24 = vpop.permute.xlu0 %852  ;;  %4702 = vmatmul.mubr.msk.f32.vlgmr.msra.gmra.mrb[2].mxu0 %vm78_vm1, %v5502_v19  ;;  %v855_v25 = vpop.permute.xlu1 %854 }
  0x81   :  { %1237 = vmatprep.mubr.f32.mxu0 %v5249_v2  ;;  %v865_v26 = vsel %vm856_vm2, %v5527_v24, %v855_v25  ;;  %4706 = vmatprep.subr.msk.mxu0 %vm82_vm0, %v855_v25 }
  0x82   :  { %3353 = vrot.lane.b32.xlu0 %v5333_v5, %s5257_s19  ;;  %4707 = vmatpush1.msk.msra.mxu0 %vm82_vm0, %v865_v26 }
  0x83   :  { %3355 = vrot.lane.b32.xlu1 %v5309_v0, %s5257_s19 }
  0x84   :  { %v1257_v27 = vpop.permute.xlu0 %1256  ;;  %4708 = vmatmul.mubr.msk.f32.vlgmr.msra.gmra.mrb[4].mxu0 %vm78_vm1, %v5502_v19  ;;  %v5542_v28 = vpop.permute.xlu1 %1258 }
  0x85   :  { %1371 = vmatprep.mubr.f32.mxu0 %v5249_v2  ;;  %v1276_v29 = vsel %vm1274_vm3, %v1257_v27, %v5542_v28 }
  0x86   :  { %3351 = vrot.lane.b32.xlu0 %v5323_v3, %s5257_s19  ;;  %4709 = vmatprep.subr.msk.mxu0 %vm82_vm0, %v1276_v29 }
  0x87   :  { %1678 = vrot.lane.b32.xlu1 %v5422_v10, %s5252_s11 }
  0x88   :  { %v1255_v30 = vpop.permute.xlu0 %1254  ;;  %v1265_v32 = vpop.permute.xlu1 %1264 }
  0x89   :  { %v1275_v33 = vsel %vm1274_vm3, %v1255_v30, %v1257_v27 }
  0x8a   :  { %1686 = vrot.lane.b32.xlu0 %v5442_v11, %s5252_s11  ;;  %4710 = vmatpush1.msk.msra.mxu0 %vm82_vm0, %v1275_v33  ;;  %s5270_s11 = smov 4  }
  0x8b   :  { %3361 = vrot.lane.b32.xlu1 %v5329_v4, %s5257_s19  ;;  %4711 = vmatmul.mubr.msk.f32.vlgmr.msra.gmra.mrb[0].mxu0 %vm78_vm1, %v5555_v31 }
  0x8c   :  { %v5565_v34 = vpop.permute.xlu0 %1266  ;;  %1513 = vmatprep.mubr.f32.mxu0 %v5249_v2  ;;  %v5568_v35 = vpop.permute.xlu1 %1262 }
  0x8d   :  { %v1280_v36 = vsel %vm1274_vm3, %v1265_v32, %v5565_v34  ;;  %v1279_v37 = vsel %vm1274_vm3, %v5568_v35, %v1265_v32 }
  0x8e   :  { %3363 = vrot.lane.b32.xlu0 %v5356_v8, %s5257_s19  ;;  %4715 = vmatprep.subr.msk.mxu0 %vm82_vm0, %v1280_v36 }
  0x8f   :  { %2096 = vrot.lane.b32.xlu1 %v5422_v10, %s5254_s13  ;;  %4716 = vmatpush1.msk.msra.mxu0 %vm82_vm0, %v1279_v37 }
  0x90   :  { %v5580_v38 = vpop.permute.xlu0 %1270  ;;  %4717 = vmatmul.mubr.msk.f32.vlgmr.msra.gmra.mrb[2].mxu0 %vm78_vm1, %v5555_v31  ;;  %v1273_v39 = vpop.permute.xlu1 %1272 }
  0x91   :  { %1655 = vmatprep.mubr.f32.mxu0 %v5249_v2  ;;  %v1283_v40 = vsel %vm1274_vm3, %v5580_v38, %v1273_v39  ;;  %4721 = vmatprep.subr.msk.mxu0 %vm82_vm0, %v1273_v39 }
  0x92   :  { %3359 = vrot.lane.b32.xlu0 %v5314_v1, %s5257_s19  ;;  %4722 = vmatpush1.msk.msra.mxu0 %vm82_vm0, %v1283_v40 }
  0x93   :  { %2104 = vrot.lane.b32.xlu1 %v5442_v11, %s5254_s13 }
  0x94   :  { %v1675_v41 = vpop.permute.xlu0 %1674  ;;  %4723 = vmatmul.mubr.msk.f32.vlgmr.msra.gmra.mrb[4].mxu0 %vm78_vm1, %v5555_v31  ;;  %v5595_v42 = vpop.permute.xlu1 %1676 }
  0x95   :  { %1789 = vmatprep.mubr.f32.mxu0 %v5249_v2  ;;  %v1694_v43 = vsel %vm1692_vm4, %v1675_v41, %v5595_v42 }
  0x96   :  { %2515 = vrot.lane.b32.xlu0 %v5422_v10, %s5255_s14  ;;  %4724 = vmatprep.subr.msk.mxu0 %vm82_vm0, %v1694_v43 }
  0x97   :  { %2523 = vrot.lane.b32.xlu1 %v5442_v11, %s5255_s14 }
  0x98   :  { %v1673_v44 = vpop.permute.xlu0 %1672  ;;  %v1683_v46 = vpop.permute.xlu1 %1682 }
  0x99   :  { %v1693_v47 = vsel %vm1692_vm4, %v1673_v44, %v1675_v41 }
  0x9a   :  { %2936 = vrot.lane.b32.xlu0 %v5422_v10, %s5256_s17  ;;  %4725 = vmatpush1.msk.msra.mxu0 %vm82_vm0, %v1693_v47 }
  0x9b   :  { %2944 = vrot.lane.b32.xlu1 %v5442_v11, %s5256_s17  ;;  %4726 = vmatmul.mubr.msk.f32.vlgmr.msra.gmra.mrb[0].mxu0 %vm78_vm1, %v5608_v45 }
  0x9c   :  { %v5618_v48 = vpop.permute.xlu0 %1684  ;;  %1931 = vmatprep.mubr.f32.mxu0 %v5249_v2  ;;  %v5621_v49 = vpop.permute.xlu1 %1680 }
  0x9d   :  { %v1698_v50 = vsel %vm1692_vm4, %v1683_v46, %v5618_v48  ;;  %v1697_v51 = vsel %vm1692_vm4, %v5621_v49, %v1683_v46 }
  0x9e   :  { %3357 = vrot.lane.b32.xlu0 %v5422_v10, %s5257_s19  ;;  %4730 = vmatprep.subr.msk.mxu0 %vm82_vm0, %v1698_v50 }
  0x9f   :  { %3365 = vrot.lane.b32.xlu1 %v5442_v11, %s5257_s19  ;;  %4731 = vmatpush1.msk.msra.mxu0 %vm82_vm0, %v1697_v51  ;;  %v5745_v51 = vld [vmem:[%s6540_s1 + $0x30] sm:$0xff] }
  0xa0   :  { %v51_v52 = vpop.permute.xlu0 %50  ;;  %4732 = vmatmul.mubr.msk.f32.vlgmr.msra.gmra.mrb[2].mxu0 %vm78_vm1, %v5608_v45  ;;  %v53_v53 = vpop.permute.xlu1 %52 }
  0xa1   :  { %2073 = vmatprep.mubr.f32.mxu0 %v5249_v2  ;;  %v70_v54 = vsel %vm68_vm5, %v51_v52, %v53_v53 }
  0xa2   :  { %3367 = vrot.lane.b32.xlu0 %v5343_v7, %s5257_s19  ;;  %4664 = vmatprep.subr.msk.mxu1 %vm82_vm0, %v70_v54 }
  0xa3   :  { %3369 = vrot.lane.b32.xlu1 %v5362_v9, %s5257_s19 }
  0xa4   :  { %v49_v56 = vpop.permute.xlu0 %48  ;;  %v5651_v59 = vpop.permute.xlu1 %1688 }
  0xa5   :  { %v69_v60 = vsel %vm68_vm5, %v49_v56, %v51_v52 }
  0xa6   :  { %3371 = vrot.lane.b32.xlu0 %v5468_v12, %s5257_s19  ;;  %4665 = vmatpush1.msk.msra.mxu1 %vm82_vm0, %v69_v60 }
  0xa7   :  { %4666 = vmatmul.mubr.msk.f32.vlgmr.msra.gmra.mrb[0].mxu1 %vm78_vm1, %v5646_v57  ;;  %3775 = vperm.xlu1 %5238, %v3772_v58  }
  0xa8   :  { %v1691_v61 = vpop.permute.xlu0 %1690  ;;  %238 = vmatprep.mubr.f32.mxu1 %v5249_v2  ;;  %v55_v62 = vpop.permute.xlu1 %54 }
  0xa9   :  { %v1701_v63 = vsel %vm1692_vm4, %v5651_v59, %v1691_v61  ;;  %4736 = vmatprep.subr.msk.mxu0 %vm82_vm0, %v1691_v61  ;;  %v71_v5 = vsel %vm68_vm5, %v53_v53, %v55_v62 }
  0xaa   :  { %4737 = vmatpush1.msk.msra.mxu0 %vm82_vm0, %v1701_v63 }
  0xab   :  { %4738 = vmatmul.mubr.msk.f32.vlgmr.msra.gmra.mrb[4].mxu0 %vm78_vm1, %v5608_v45 }
  0xac   :  { %v57_v1 = vpop.permute.xlu0 %56  ;;  %2207 = vmatprep.mubr.f32.mxu0 %v5249_v2  ;;  %v2093_v3 = vpop.permute.xlu1 %2092 }
  0xad   :  { %v72_v4 = vsel %vm68_vm5, %v55_v62, %v57_v1 }
  0xae   :  { %4667 = vmatprep.subr.msk.mxu1 %vm82_vm0, %v72_v4 }
  0xaf   :  { %4668 = vmatpush1.msk.msra.mxu1 %vm82_vm0, %v71_v5 }
  0xb0   :  { %v5671_v7 = vpop.permute.xlu0 %2094  ;;  %4669 = vmatmul.mubr.msk.f32.vlgmr.msra.gmra.mrb[2].mxu1 %vm78_vm1, %v5646_v57  ;;  %v2091_v9 = vpop.permute.xlu1 %2090 }
  0xb1   :  { %v2112_v12 = vsel %vm2110_vm6, %v2093_v3, %v5671_v7  ;;  %309 = vmatprep.mubr.f32.mxu1 %v5249_v2  ;;  %v2111_v15 = vsel %vm2110_vm6, %v2091_v9, %v2093_v3  ;;  %v5800_v3 = vld [vmem:[%s6540_s1 + $0x38] sm:$0xff] }
  0xb2   :  { %4739 = vmatprep.subr.msk.mxu0 %vm82_vm0, %v2112_v12 }
  0xb3   :  { %4740 = vmatpush1.msk.msra.mxu0 %vm82_vm0, %v2111_v15 }
  0xb4   :  { %v59_v16 = vpop.permute.xlu0 %58  ;;  %4741 = vmatmul.mubr.msk.f32.vlgmr.msra.gmra.mrb[0].mxu0 %vm78_vm1, %v5680_v14  ;;  %v61_v17 = vpop.permute.xlu1 %60 }
  0xb5   :  { %v73_v18 = vsel %vm68_vm5, %v57_v1, %v59_v16  ;;  %2349 = vmatprep.mubr.f32.mxu0 %v5249_v2  ;;  %v74_v22 = vsel %vm68_vm5, %v59_v16, %v61_v17 }
  0xb6   :  { %4670 = vmatprep.subr.msk.mxu1 %vm82_vm0, %v74_v22 }
  0xb7   :  { %4671 = vmatpush1.msk.msra.mxu1 %vm82_vm0, %v73_v18 }
  0xb8   :  { %v2101_v23 = vpop.permute.xlu0 %2100  ;;  %v5693_v25 = vpop.permute.xlu1 %2102  ;;  %4672 = vmatmul.mubr.msk.f32.vlgmr.msra.gmra.mrb[4].mxu1 %vm78_vm1, %v5646_v57 }
  0xb9   :  { %v2116_v26 = vsel %vm2110_vm6, %v2101_v23, %v5693_v25  ;;  %380 = vmatprep.mubr.f32.mxu1 %v5249_v2 }
  0xba   :  { %4745 = vmatprep.subr.msk.mxu0 %vm82_vm0, %v2116_v26 }
  0xbc   :  { %v5701_v27 = vpop.permute.xlu0 %2098  ;;  %v63_v29 = vpop.permute.xlu1 %62 }
  0xbd   :  { %v2115_v30 = vsel %vm2110_vm6, %v5701_v27, %v2101_v23  ;;  %v75_v37 = vsel %vm68_vm5, %v61_v17, %v63_v29 }
  0xbe   :  { %4746 = vmatpush1.msk.msra.mxu0 %vm82_vm0, %v2115_v30 }
  0xbf   :  { %4747 = vmatmul.mubr.msk.f32.vlgmr.msra.gmra.mrb[2].mxu0 %vm78_vm1, %v5680_v14 }
  0xc0   :  { %v65_v32 = vpop.permute.xlu0 %64  ;;  %2491 = vmatprep.mubr.f32.mxu0 %v5249_v2  ;;  %v5709_v33 = vpop.permute.xlu1 %2106 }
  0xc1   :  { %v76_v36 = vsel %vm68_vm5, %v63_v29, %v65_v32 }
  0xc2   :  { %4673 = vmatprep.subr.msk.mxu1 %vm82_vm0, %v76_v36 }
  0xc3   :  { %4674 = vmatpush1.msk.msra.mxu1 %vm82_vm0, %v75_v37 }
  0xc4   :  { %v2109_v39 = vpop.permute.xlu0 %2108  ;;  %4675 = vmatmul.mubr.msk.f32.vlgmr.msra.gmra.mrb[6].mxu1 %vm78_vm1, %v5646_v57  ;;  %v67_v40 = vpop.permute.xlu1 %66 }
  0xc5   :  { %v2119_v41 = vsel %vm2110_vm6, %v5709_v33, %v2109_v39  ;;  %4751 = vmatprep.subr.msk.mxu0 %vm82_vm0, %v2109_v39  ;;  %451 = vmatprep.mubr.f32.mxu1 %v5249_v2  ;;  %v77_v43 = vsel %vm68_vm5, %v65_v32, %v67_v40 }
  0xc6   :  { %4676 = vmatprep.subr.msk.mxu1 %vm82_vm0, %v67_v40  ;;  %4752 = vmatpush1.msk.msra.mxu0 %vm82_vm0, %v2119_v41  ;;  %v5865_v40 = vld [vmem:[%s6540_s1 + $0x40] sm:$0xff]  ;;  %s5269_s1 = smov 1  }
  0xc7   :  { %4677 = vmatpush1.msk.msra.mxu1 %vm82_vm0, %v77_v43  ;;  %4753 = vmatmul.mubr.msk.f32.vlgmr.msra.gmra.mrb[4].mxu0 %vm78_vm1, %v5680_v14 }
  0xc8   :  { %v2512_v44 = vpop.permute.xlu0 %2511  ;;  %2629 = vmatprep.mubr.f32.mxu0 %v5249_v2  ;;  %4678 = vmatmul.mubr.msk.f32.vlgmr.msra.gmra.mrb[8].mxu1 %vm78_vm1, %v5646_v57  ;;  %v5730_v46 = vpop.permute.xlu1 %2513 }
  0xc9   :  { %4682 = vmatprep.subr.msk.mxu1 %vm82_vm0, %v5422_v10  ;;  %616 = vmatprep.mubr.f32.mxu1 %v5249_v2  ;;  %v2533_v47 = vsel %vm2531_vm7, %v2512_v44, %v5730_v46 }
  0xca   :  { %4683 = vmatpush1.msk.msra.mxu1 %vm82_vm0, %v5309_v0  ;;  %4754 = vmatprep.subr.msk.mxu0 %vm82_vm0, %v2533_v47 }
  0xcb   :  { %4688 = vmatprep.subr.msk.mxu1 %vm82_vm0, %v5442_v11 }
  0xcc   :  { %v2510_v50 = vpop.permute.xlu0 %2509  ;;  %4684 = vmatmul.mubr.msk.f32.vlgmr.msra.gmra.mrb[2].mxu1 %vm78_vm1, %v5338_v6  ;;  %v2520_v10 = vpop.permute.xlu1 %2519 }
  0xcd   :  { %v2532_v52 = vsel %vm2531_vm7, %v2510_v50, %v2512_v44  ;;  %4689 = vmatpush1.msk.msra.mxu1 %vm82_vm0, %v5356_v8  ;;  %758 = vmatprep.mubr.f32.mxu1 %v5249_v2 }
  0xce   :  { %4755 = vmatpush1.msk.msra.mxu0 %vm82_vm0, %v2532_v52 }
  0xcf   :  { %4756 = vmatmul.mubr.msk.f32.vlgmr.msra.gmra.mrb[0].mxu0 %vm78_vm1, %v5745_v51 }
  0xd0   :  { %v5756_v0 = vpop.permute.xlu0 %2521  ;;  %2771 = vmatprep.mubr.f32.mxu0 %v5249_v2  ;;  %4690 = vmatmul.mubr.msk.f32.vlgmr.msra.gmra.mrb[6].mxu1 %vm78_vm1, %v5338_v6  ;;  %v5761_v11 = vpop.permute.xlu1 %2517 }
  0xd1   :  { %v2537_v53 = vsel %vm2531_vm7, %v2520_v10, %v5756_v0  ;;  %1024 = vmatprep.mubr.f32.mxu1 %v5249_v2  ;;  %v2536_v8 = vsel %vm2531_vm7, %v5761_v11, %v2520_v10 }
  0xd2   :  { %4760 = vmatprep.subr.msk.mxu0 %vm82_vm0, %v2537_v53 }
  0xd3   :  { %4761 = vmatpush1.msk.msra.mxu0 %vm82_vm0, %v2536_v8 }
  0xd4   :  { %v2528_v54 = vpop.permute.xlu0 %2527  ;;  %4762 = vmatmul.mubr.msk.f32.vlgmr.msra.gmra.mrb[2].mxu0 %vm78_vm1, %v5745_v51  ;;  %v2530_v56 = vpop.permute.xlu1 %2529 }
  0xd5   :  { %2913 = vmatprep.mubr.f32.mxu0 %v5249_v2  ;;  %v2541_v6 = vsel %vm2531_vm7, %v2528_v54, %v2530_v56 }
  0xd6   :  { %4766 = vmatprep.subr.msk.mxu0 %vm82_vm0, %v2541_v6 }
  0xd8   :  { %v5775_v57 = vpop.permute.xlu0 %2525  ;;  %v843_v58 = vpop.permute.xlu1 %842 }
  0xd9   :  { %v2540_v60 = vsel %vm2531_vm7, %v5775_v57, %v2528_v54  ;;  %v859_v61 = vsel %vm856_vm2, %v5490_v13, %v843_v58  ;;  %v860_v62 = vsel %vm856_vm2, %v843_v58, %v5514_v21 }
  0xda   :  { %4767 = vmatpush1.msk.msra.mxu0 %vm82_vm0, %v2540_v60  ;;  %4697 = vmatprep.subr.msk.mxu1 %vm82_vm0, %v860_v62 }
  0xdb   :  { %4768 = vmatmul.mubr.msk.f32.vlgmr.msra.gmra.mrb[4].mxu0 %vm78_vm1, %v5745_v51  ;;  %4698 = vmatpush1.msk.msra.mxu1 %vm82_vm0, %v859_v61 }
  0xdc   :  { %v2933_v63 = vpop.permute.xlu0 %2932  ;;  %3050 = vmatprep.mubr.f32.mxu0 %v5249_v2  ;;  %v5789_v1 = vpop.permute.xlu1 %2934  ;;  %4699 = vmatmul.mubr.msk.f32.vlgmr.msra.gmra.mrb[2].mxu1 %vm78_vm1, %v5502_v19 }
  0xdd   :  { %v2954_v13 = vsel %vm2952_vm8, %v2933_v63, %v5789_v1  ;;  %1166 = vmatprep.mubr.f32.mxu1 %v5249_v2 }
  0xde   :  { %4769 = vmatprep.subr.msk.mxu0 %vm82_vm0, %v2954_v13 }
  0xe0   :  { %v2931_v21 = vpop.permute.xlu0 %2930  ;;  %v851_v4 = vpop.permute.xlu1 %850 }
  0xe1   :  { %v2953_v5 = vsel %vm2952_vm8, %v2931_v21, %v2933_v63  ;;  %v863_v9 = vsel %vm856_vm2, %v5510_v20, %v851_v4  ;;  %v864_v12 = vsel %vm856_vm2, %v851_v4, %v5527_v24 }
  0xe2   :  { %4770 = vmatpush1.msk.msra.mxu0 %vm82_vm0, %v2953_v5  ;;  %4703 = vmatprep.subr.msk.mxu1 %vm82_vm0, %v864_v12  ;;  %v3814_v5 = vld [vmem:[%s6542_s3 + $0x80] sm:$0xff] }
  0xe3   :  { %4771 = vmatmul.mubr.msk.f32.vlgmr.msra.gmra.mrb[0].mxu0 %vm78_vm1, %v5800_v3  ;;  %4704 = vmatpush1.msk.msra.mxu1 %vm82_vm0, %v863_v9  ;;  %v3815_v9 = vld [vmem:[%s6542_s3 + $0x88] sm:$0xff] }
  0xe4   :  { %v2941_v15 = vpop.permute.xlu0 %2940  ;;  %3192 = vmatprep.mubr.f32.mxu0 %v5249_v2  ;;  %v5813_v16 = vpop.permute.xlu1 %2942  ;;  %4705 = vmatmul.mubr.msk.f32.vlgmr.msra.gmra.mrb[6].mxu1 %vm78_vm1, %v5502_v19 }
  0xe5   :  { %v2958_v20 = vsel %vm2952_vm8, %v2941_v15, %v5813_v16  ;;  %1442 = vmatprep.mubr.f32.mxu1 %v5249_v2 }
  0xe6   :  { %4775 = vmatprep.subr.msk.mxu0 %vm82_vm0, %v2958_v20  ;;  %v4958_v20 = vpack.c.bf16 %v3815_v9, %v3814_v5  ;;  %v3885_v5 = vld [vmem:[%s6542_s3 + $0x2b8] sm:$0xff]  ;;  %v3810_v9 = vld [vmem:[%s6542_s3 + $0x60] sm:$0xff] }
  0xe8   :  { %v5821_v24 = vpop.permute.xlu0 %2938  ;;  %v1261_v17 = vpop.permute.xlu1 %1260 }
  0xe9   :  { %v2957_v18 = vsel %vm2952_vm8, %v5821_v24, %v2941_v15  ;;  %v1277_v22 = vsel %vm1274_vm3, %v5542_v28, %v1261_v17  ;;  %v1278_v23 = vsel %vm1274_vm3, %v1261_v17, %v5568_v35  ;;  %v3799_v17 = vld [vmem:[%s6542_s3 + $0x8] sm:$0xff] }
  0xea   :  { %4776 = vmatpush1.msk.msra.mxu0 %vm82_vm0, %v2957_v18  ;;  %4712 = vmatprep.subr.msk.mxu1 %vm82_vm0, %v1278_v23  ;;  %v3817_v18 = vld [vmem:[%s6542_s3 + $0x98] sm:$0xff] }
  0xeb   :  { %4777 = vmatmul.mubr.msk.f32.vlgmr.msra.gmra.mrb[2].mxu0 %vm78_vm1, %v5800_v3  ;;  %4713 = vmatpush1.msk.msra.mxu1 %vm82_vm0, %v1277_v22 }
  0xec   :  { %v2949_v19 = vpop.permute.xlu0 %2948  ;;  %3334 = vmatprep.mubr.f32.mxu0 %v5249_v2  ;;  %4714 = vmatmul.mubr.msk.f32.vlgmr.msra.gmra.mrb[2].mxu1 %vm78_vm1, %v5555_v31 }
  0xed   :  { %v2951_v26 = vpop.permute.xlu1 %2950  ;;  %1584 = vmatprep.mubr.f32.mxu1 %v5249_v2 }
  0xee   :  { %v2962_v28 = vsel %vm2952_vm8, %v2949_v19, %v2951_v26 }
  0xef   :  { %4781 = vmatprep.subr.msk.mxu0 %vm82_vm0, %v2962_v28  ;;  %v3801_v28 = vld [vmem:[%s6542_s3 + $0x18] sm:$0xff] }
  0xf0   :  { %v5840_v35 = vpop.permute.xlu0 %2946 }
  0xf1   :  { %v1269_v29 = vpop.permute.xlu1 %1268  ;;  %v2961_v30 = vsel %vm2952_vm8, %v5840_v35, %v2949_v19  ;;  %v3800_v19 = vld [vmem:[%s6542_s3 + $0x10] sm:$0xff] }
  0xf2   :  { %v1281_v32 = vsel %vm1274_vm3, %v5565_v34, %v1269_v29  ;;  %v1282_v36 = vsel %vm1274_vm3, %v1269_v29, %v5580_v38  ;;  %4782 = vmatpush1.msk.msra.mxu0 %vm82_vm0, %v2961_v30  ;;  %v3879_v29 = vld [vmem:[%s6542_s3 + $0x288] sm:$0xff]  ;;  %v3818_v30 = vld [vmem:[%s6542_s3 + $0xa0] sm:$0xff] }
  0xf3   :  { %4718 = vmatprep.subr.msk.mxu1 %vm82_vm0, %v1282_v36  ;;  %4783 = vmatmul.mubr.msk.f32.vlgmr.msra.gmra.mrb[4].mxu0 %vm78_vm1, %v5800_v3 }
  0xf4   :  { %4719 = vmatpush1.msk.msra.mxu1 %vm82_vm0, %v1281_v32  ;;  %v3354_v37 = vpop.permute.xlu0 %3353  ;;  %3471 = vmatprep.mubr.f32.mxu0 %v5249_v2  ;;  %v3819_v32 = vld [vmem:[%s6542_s3 + $0xa8] sm:$0xff] }
  0xf5   :  { %v5854_v39 = vpop.permute.xlu1 %3355  ;;  %4720 = vmatmul.mubr.msk.f32.vlgmr.msra.gmra.mrb[6].mxu1 %vm78_vm1, %v5555_v31 }
  0xf6   :  { %v3375_v34 = vsel %vm3373_vm9, %v3354_v37, %v5854_v39  ;;  %1860 = vmatprep.mubr.f32.mxu1 %v5249_v2 }
  0xf7   :  { %4784 = vmatprep.subr.msk.mxu0 %vm82_vm0, %v3375_v34  ;;  %v4964_v34 = vpack.c.bf16 %v3801_v28, %v3800_v19  ;;  %v3887_v19 = vld [vmem:[%s6542_s3 + $0x2c8] sm:$0xff]  ;;  %v3813_v28 = vld [vmem:[%s6542_s3 + $0x78] sm:$0xff] }
  0xf8   :  { %v3352_v38 = vpop.permute.xlu0 %3351 }
  0xf9   :  { %v1679_v41 = vpop.permute.xlu1 %1678  ;;  %v3374_v43 = vsel %vm3373_vm9, %v3352_v38, %v3354_v37  ;;  %v3862_v37 = vld [vmem:[%s6542_s3 + $0x200] sm:$0xff] }
  0xfa   :  { %v1695_v44 = vsel %vm1692_vm4, %v5595_v42, %v1679_v41  ;;  %v1696_v31 = vsel %vm1692_vm4, %v1679_v41, %v5621_v49  ;;  %4785 = vmatpush1.msk.msra.mxu0 %vm82_vm0, %v3374_v43  ;;  %v3802_v38 = vld [vmem:[%s6542_s3 + $0x20] sm:$0xff]  ;;  %v3880_v43 = vld [vmem:[%s6542_s3 + $0x290] sm:$0xff] }
  0xfb   :  { %4727 = vmatprep.subr.msk.mxu1 %vm82_vm0, %v1696_v31  ;;  %4786 = vmatmul.mubr.msk.f32.vlgmr.msra.gmra.mrb[0].mxu0 %vm78_vm1, %v5865_v40  ;;  %v3803_v31 = vld [vmem:[%s6542_s3 + $0x28] sm:$0xff] }
  0xfc   :  { %4728 = vmatpush1.msk.msra.mxu1 %vm82_vm0, %v1695_v44  ;;  %v1687_v47 = vpop.permute.xlu0 %1686  ;;  %3613 = vmatprep.mubr.f32.mxu0 %v5249_v2  ;;  %v4966_v44 = vpack.c.bf16 %v3819_v32, %v3818_v30  ;;  %v3870_v30 = vld [vmem:[%s6542_s3 + $0x240] sm:$0xff]  ;;  %v3871_v32 = vld [vmem:[%s6542_s3 + $0x248] sm:$0xff] }
  0xfd   :  { %v3362_v50 = vpop.permute.xlu1 %3361  ;;  %4729 = vmatmul.mubr.msk.f32.vlgmr.msra.gmra.mrb[2].mxu1 %vm78_vm1, %v5608_v45  ;;  %v1699_v42 = vsel %vm1692_vm4, %v5618_v48, %v1687_v47  ;;  %v1700_v49 = vsel %vm1692_vm4, %v1687_v47, %v5651_v59 }
  0xfe   :  { %4733 = vmatprep.subr.msk.mxu1 %vm82_vm0, %v1700_v49  ;;  %2002 = vmatprep.mubr.f32.mxu1 %v5249_v2  ;;  %v3820_v49 = vld [vmem:[%s6542_s3 + $0xb0] sm:$0xff] }
  0xff   :  { %4734 = vmatpush1.msk.msra.mxu1 %vm82_vm0, %v1699_v42  ;;  %v3865_v42 = vld [vmem:[%s6542_s3 + $0x218] sm:$0xff] }
 0x100   :  { %v5887_v10 = vpop.permute.xlu0 %3363 }
 0x101   :  { %v2097_v52 = vpop.permute.xlu1 %2096  ;;  %4735 = vmatmul.mubr.msk.f32.vlgmr.msra.gmra.mrb[6].mxu1 %vm78_vm1, %v5608_v45  ;;  %v3379_v53 = vsel %vm3373_vm9, %v3362_v50, %v5887_v10 }
 0x102   :  { %v2113_v48 = vsel %vm2110_vm6, %v5671_v7, %v2097_v52  ;;  %v2114_v59 = vsel %vm2110_vm6, %v2097_v52, %v5701_v27  ;;  %4790 = vmatprep.subr.msk.mxu0 %vm82_vm0, %v3379_v53  ;;  %2278 = vmatprep.mubr.f32.mxu1 %v5249_v2  ;;  %v3882_v53 = vld [vmem:[%s6542_s3 + $0x2a0] sm:$0xff] }
 0x103   :  { %4742 = vmatprep.subr.msk.mxu1 %vm82_vm0, %v2114_v59  ;;  %v4968_v59 = vpack.c.bf16 %v3803_v31, %v3802_v38 }
 0x104   :  { %4743 = vmatpush1.msk.msra.mxu1 %vm82_vm0, %v2113_v48  ;;  %v3360_v8 = vpop.permute.xlu0 %3359  ;;  %v3883_v48 = vld [vmem:[%s6542_s3 + $0x2a8] sm:$0xff] }
 0x105   :  { %v2105_v54 = vpop.permute.xlu1 %2104  ;;  %4744 = vmatmul.mubr.msk.f32.vlgmr.msra.gmra.mrb[2].mxu1 %vm78_vm1, %v5680_v14  ;;  %v3378_v45 = vsel %vm3373_vm9, %v3360_v8, %v3362_v50  ;;  %v3864_v50 = vld [vmem:[%s6542_s3 + $0x210] sm:$0xff] }
 0x106   :  { %v2117_v7 = vsel %vm2110_vm6, %v5693_v25, %v2105_v54  ;;  %v2118_v27 = vsel %vm2110_vm6, %v2105_v54, %v5709_v33  ;;  %4791 = vmatpush1.msk.msra.mxu0 %vm82_vm0, %v3378_v45  ;;  %2420 = vmatprep.mubr.f32.mxu1 %v5249_v2  ;;  %v5028_v52 = vpack.c.bf16 %v3865_v42, %v3864_v50  ;;  %v3866_v54 = vld [vmem:[%s6542_s3 + $0x220] sm:$0xff]  ;;  %v3867_v45 = vld [vmem:[%s6542_s3 + $0x228] sm:$0xff] }
 0x107   :  { %4748 = vmatprep.subr.msk.mxu1 %vm82_vm0, %v2118_v27  ;;  %4792 = vmatmul.mubr.msk.f32.vlgmr.msra.gmra.mrb[2].mxu0 %vm78_vm1, %v5865_v40  ;;  %v3804_v27 = vld [vmem:[%s6542_s3 + $0x30] sm:$0xff]  ;;  %v3891_v50 = vld [vmem:[%s6542_s3 + $0x2e8] sm:$0xff] }
 0x108   :  { %4749 = vmatpush1.msk.msra.mxu1 %vm82_vm0, %v2117_v7  ;;  %v2516_v56 = vpop.permute.xlu0 %2515  ;;  %3755 = vmatprep.mubr.f32.mxu0 %v5249_v2 }
 0x109   :  { %v2524_v6 = vpop.permute.xlu1 %2523  ;;  %4750 = vmatmul.mubr.msk.f32.vlgmr.msra.gmra.mrb[6].mxu1 %vm78_vm1, %v5680_v14  ;;  %v2534_v25 = vsel %vm2531_vm7, %v5730_v46, %v2516_v56  ;;  %v2535_v33 = vsel %vm2531_vm7, %v2516_v56, %v5761_v11  ;;  %v3805_v56 = vld [vmem:[%s6542_s3 + $0x38] sm:$0xff] }
 0x10a   :  { %4757 = vmatprep.subr.msk.mxu1 %vm82_vm0, %v2535_v33  ;;  %2700 = vmatprep.mubr.f32.mxu1 %v5249_v2  ;;  %v2539_v58 = vsel %vm2531_vm7, %v2524_v6, %v5775_v57  ;;  %v2538_v14 = vsel %vm2531_vm7, %v5756_v0, %v2524_v6  ;;  %v3822_v6 = vld [vmem:[%s6542_s3 + $0xc0] sm:$0xff]  ;;  %v5032_v33 = vpack.c.bf16 %v3867_v45, %v3866_v54  ;;  %v3877_v54 = vld [vmem:[%s6542_s3 + $0x278] sm:$0xff] }
 0x10b   :  { %4758 = vmatpush1.msk.msra.mxu1 %vm82_vm0, %v2534_v25  ;;  %v3823_v25 = vld [vmem:[%s6542_s3 + $0xc8] sm:$0xff] }
 0x10c   :  { %4763 = vmatprep.subr.msk.mxu1 %vm82_vm0, %v2539_v58  ;;  %v2937_v60 = vpop.permute.xlu0 %2936  ;;  %v4972_v58 = vpack.c.bf16 %v3805_v56, %v3804_v27 }
 0x10d   :  { %v2945_v61 = vpop.permute.xlu1 %2944  ;;  %4759 = vmatmul.mubr.msk.f32.vlgmr.msra.gmra.mrb[2].mxu1 %vm78_vm1, %v5745_v51  ;;  %v2956_v46 = vsel %vm2952_vm8, %v2937_v60, %v5821_v24  ;;  %v2955_v57 = vsel %vm2952_vm8, %v5789_v1, %v2937_v60  ;;  %v3798_v24 = vld [vmem:[%s6542_s3] sm:$0xff]  ;;  %v4974_v60 = vpack.c.bf16 %v3823_v25, %v3822_v6 }
 0x10e   :  { %4764 = vmatpush1.msk.msra.mxu1 %vm82_vm0, %v2538_v14  ;;  %2842 = vmatprep.mubr.f32.mxu1 %v5249_v2  ;;  %v2960_v0 = vsel %vm2952_vm8, %v2945_v61, %v5840_v35  ;;  %v2959_v13 = vsel %vm2952_vm8, %v5813_v16, %v2945_v61  ;;  %v4960_v23 = vpack.c.bf16 %v3799_v17, %v3798_v24  ;;  %v3878_v35 = vld [vmem:[%s6542_s3 + $0x280] sm:$0xff]  ;;  %v3807_v61 = vld [vmem:[%s6542_s3 + $0x48] sm:$0xff]  ;;  %v3869_v24 = vld [vmem:[%s6542_s3 + $0x238] sm:$0xff] }
 0x10f   :  { %4772 = vmatprep.subr.msk.mxu1 %vm82_vm0, %v2956_v46  ;;  %v5022_v36 = vpack.c.bf16 %v3879_v29, %v3878_v35  ;;  %v3806_v14 = vld [vmem:[%s6542_s3 + $0x40] sm:$0xff]  ;;  %v3824_v46 = vld [vmem:[%s6542_s3 + $0xd0] sm:$0xff] }
 0x110   :  { %v3358_v11 = vpop.permute.xlu0 %3357 }
 0x111   :  { %4765 = vmatmul.mubr.msk.f32.vlgmr.msra.gmra.mrb[6].mxu1 %vm78_vm1, %v5745_v51  ;;  %v3366_v62 = vpop.permute.xlu1 %3365  ;;  %v3377_v1 = vsel %vm3373_vm9, %v3358_v11, %v3360_v8  ;;  %v3376_v12 = vsel %vm3373_vm9, %v5854_v39, %v3358_v11  ;;  %v3863_v39 = vld [vmem:[%s6542_s3 + $0x208] sm:$0xff]  ;;  %v5030_v8 = vpack.c.bf16 %v3883_v48, %v3882_v53  ;;  %v3825_v11 = vld [vmem:[%s6542_s3 + $0xd8] sm:$0xff]  ;;  %v3892_v53 = vld [vmem:[%s6542_s3 + $0x2f0] sm:$0xff] }
 0x112   :  { %4773 = vmatpush1.msk.msra.mxu1 %vm82_vm0, %v2955_v57  ;;  %3121 = vmatprep.mubr.f32.mxu1 %v5249_v2  ;;  %v3380_v22 = vsel %vm3373_vm9, %v5887_v10, %v3366_v62  ;;  %v5024_v41 = vpack.c.bf16 %v3863_v39, %v3862_v37  ;;  %v3821_v10 = vld [vmem:[%s6542_s3 + $0xb8] sm:$0xff]  ;;  %v4976_v57 = vpack.c.bf16 %v3807_v61, %v3806_v14  ;;  %v3846_v37 = vld [vmem:[%s6542_s3 + $0x180] sm:$0xff]  ;;  %v3847_v39 = vld [vmem:[%s6542_s3 + $0x188] sm:$0xff] }
 0x113   :  { %4778 = vmatprep.subr.msk.mxu1 %vm82_vm0, %v2960_v0  ;;  %v4970_v7 = vpack.c.bf16 %v3821_v10, %v3820_v49  ;;  %v4978_v0 = vpack.c.bf16 %v3825_v11, %v3824_v46  ;;  %v4990_v38 = vpack.c.bf16 %v3847_v39, %v3846_v37  ;;  %v3874_v49 = vld [vmem:[%s6542_s3 + $0x260] sm:$0xff]  ;;  %v3875_v10 = vld [vmem:[%s6542_s3 + $0x268] sm:$0xff]  ;;  %v3893_v48 = vld [vmem:[%s6542_s3 + $0x2f8] sm:$0xff] }
 0x114   :  { %v3368_v63 = vpop.permute.xlu0 %3367  ;;  %v3926_v37 = vld [vmem:[%s6542_s3 + $0x400] sm:$0xff]  ;;  %v3927_v39 = vld [vmem:[%s6542_s3 + $0x408] sm:$0xff] }
 0x115   :  { %4774 = vmatmul.mubr.msk.f32.vlgmr.msra.gmra.mrb[2].mxu1 %vm78_vm1, %v5800_v3  ;;  %v3370_v51 = vpop.permute.xlu1 %3369  ;;  %v3381_v21 = vsel %vm3373_vm9, %v3366_v62, %v3368_v63  ;;  %v3808_v62 = vld [vmem:[%s6542_s3 + $0x50] sm:$0xff] }
 0x116   :  { %4779 = vmatpush1.msk.msra.mxu1 %vm82_vm0, %v2959_v13  ;;  %3263 = vmatprep.mubr.f32.mxu1 %v5249_v2  ;;  %v3382_v15 = vsel %vm3373_vm9, %v3368_v63, %v3370_v51  ;;  %v3809_v63 = vld [vmem:[%s6542_s3 + $0x58] sm:$0xff] }
 0x117   :  { %4787 = vmatprep.subr.msk.mxu1 %vm82_vm0, %v3377_v1  ;;  %v4980_v13 = vpack.c.bf16 %v3809_v63, %v3808_v62  ;;  %v3826_v1 = vld [vmem:[%s6542_s3 + $0xe0] sm:$0xff]  ;;  %v3831_v62 = vld [vmem:[%s6542_s3 + $0x108] sm:$0xff] }
 0x118   :  { %v3372_v4 = vpop.permute.xlu0 %3371 }
 0x119   :  { %4780 = vmatmul.mubr.msk.f32.vlgmr.msra.gmra.mrb[6].mxu1 %vm78_vm1, %v5800_v3  ;;  %v3383_v16 = vsel %vm3373_vm9, %v3370_v51, %v3372_v4  ;;  %v3816_v3 = vld [vmem:[%s6542_s3 + $0x90] sm:$0xff]  ;;  %v3827_v51 = vld [vmem:[%s6542_s3 + $0xe8] sm:$0xff] }
 0x11a   :  { %4788 = vmatpush1.msk.msra.mxu1 %vm82_vm0, %v3376_v12  ;;  %4796 = vmatprep.subr.msk.mxu0 %vm82_vm0, %v3383_v16  ;;  %v4962_v26 = vpack.c.bf16 %v3817_v18, %v3816_v3  ;;  %v4982_v4 = vpack.c.bf16 %v3827_v51, %v3826_v1  ;;  %v3811_v12 = vld [vmem:[%s6542_s3 + $0x68] sm:$0xff]  ;;  %v3828_v3 = vld [vmem:[%s6542_s3 + $0xf0] sm:$0xff]  ;;  %v3829_v18 = vld [vmem:[%s6542_s3 + $0xf8] sm:$0xff] }
 0x11b   :  { %3542 = vmatprep.mubr.f32.mxu1 %v5249_v2  ;;  %4793 = vmatprep.subr.msk.mxu1 %vm82_vm0, %v3381_v21  ;;  %v3884_v21 = vld [vmem:[%s6542_s3 + $0x2b0] sm:$0xff]  ;;  %v4984_v16 = vpack.c.bf16 %v3811_v12, %v3810_v9  ;;  %v3849_v1 = vld [vmem:[%s6542_s3 + $0x198] sm:$0xff] }
 0x11c   :  { %4797 = vmatpush1.msk.msra.mxu0 %vm82_vm0, %v3382_v15  ;;  %v5034_v15 = vpack.c.bf16 %v3885_v5, %v3884_v21  ;;  %v3832_v9 = vld [vmem:[%s6542_s3 + $0x110] sm:$0xff]  ;;  %v3833_v12 = vld [vmem:[%s6542_s3 + $0x118] sm:$0xff] }
 0x11d   :  { %4789 = vmatmul.mubr.msk.f32.vlgmr.msra.gmra.mrb[2].mxu1 %vm78_vm1, %v5865_v40  ;;  %4798 = vmatmul.mubr.msk.f32.vlgmr.msra.gmra.mrb[4].mxu0 %vm78_vm1, %v5865_v40 }
 0x11e   :  { %4794 = vmatpush1.msk.msra.mxu1 %vm82_vm0, %v3380_v22  ;;  %3684 = vmatprep.mubr.f32.mxu1 %v5249_v2  ;;  %v3886_v22 = vld [vmem:[%s6542_s3 + $0x2c0] sm:$0xff]  ;;  %vm4637_vm0 = vcmask 257024  }
 0x11f   :  { %4959 = vmatprep.subr.bf16.mxu1 %v4958_v20  ;;  %5023 = vmatprep.subr.bf16.mxu0 %v5022_v36  ;;  %v3868_v20 = vld [vmem:[%s6542_s3 + $0x230] sm:$0xff]  ;;  %v5038_v35 = vpack.c.bf16 %v3887_v19, %v3886_v22  ;;  %v5040_v36 = vpack.c.bf16 %v3871_v32, %v3870_v30 }
 0x120   :  { %5025 = vmatpush3.bf16.msra.mxu0 %v5024_v41  ;;  %v5036_v17 = vpack.c.bf16 %v3869_v24, %v3868_v20  ;;  %v3889_v41 = vld [vmem:[%s6542_s3 + $0x2d8] sm:$0xff]  ;;  %v4996_v20 = vpack.c.bf16 %v3833_v12, %v3832_v9  ;;  %v3852_v22 = vld [vmem:[%s6542_s3 + $0x1b0] sm:$0xff]  ;;  %v3934_v9 = vld [vmem:[%s6542_s3 + $0x440] sm:$0xff] }
 0x121   :  { %4795 = vmatmul.mubr.msk.f32.vlgmr.msra.gmra.mrb[6].mxu1 %vm78_vm1, %v5865_v40  ;;  %v3881_v40 = vld [vmem:[%s6542_s3 + $0x298] sm:$0xff]  ;;  %v3935_v12 = vld [vmem:[%s6542_s3 + $0x448] sm:$0xff] }
 0x122   :  { %4961 = vmatpush3.bf16.msra.mxu1 %v4960_v23  ;;  %v5026_v47 = vpack.c.bf16 %v3881_v40, %v3880_v43  ;;  %v4986_v23 = vpack.c.bf16 %v3829_v18, %v3828_v3  ;;  %v3872_v40 = vld [vmem:[%s6542_s3 + $0x250] sm:$0xff]  ;;  %v3835_v3 = vld [vmem:[%s6542_s3 + $0x128] sm:$0xff] }
 0x123   :  { %4963 = vmatprep.subr.bf16.mxu1 %v4962_v26  ;;  %v3812_v26 = vld [vmem:[%s6542_s3 + $0x70] sm:$0xff] }
 0x124   :  { %5027 = vmatprep.subr.bf16.mxu0 %v5026_v47  ;;  %v4988_v29 = vpack.c.bf16 %v3813_v28, %v3812_v26  ;;  %v3890_v47 = vld [vmem:[%s6542_s3 + $0x2e0] sm:$0xff] }
 0x125   :  { %5029 = vmatpush3.bf16.msra.mxu0 %v5028_v52  ;;  %v5046_v42 = vpack.c.bf16 %v3891_v50, %v3890_v47  ;;  %v5048_v52 = vpack.c.bf16 %v3875_v10, %v3874_v49  ;;  %v3928_v49 = vld [vmem:[%s6542_s3 + $0x410] sm:$0xff]  ;;  %v3929_v10 = vld [vmem:[%s6542_s3 + $0x418] sm:$0xff] }
 0x126   :  { %4965 = vmatpush3.bf16.msra.mxu1 %v4964_v34  ;;  %5031 = vmatprep.subr.bf16.mxu0 %v5030_v8  ;;  %v3888_v34 = vld [vmem:[%s6542_s3 + $0x2d0] sm:$0xff]  ;;  %v6178_v14 = vpop.permute.xlu1 %3775 }
 0x127   :  { %4967 = vmatprep.subr.bf16.mxu1 %v4966_v44  ;;  %v5042_v43 = vpack.c.bf16 %v3889_v41, %v3888_v34  ;;  %v3873_v44 = vld [vmem:[%s6542_s3 + $0x258] sm:$0xff]  ;;  %v3876_v8 = vld [vmem:[%s6542_s3 + $0x270] sm:$0xff]  ;;  %v3855_v41 = vld [vmem:[%s6542_s3 + $0x1c8] sm:$0xff] }
 0x128   :  { %v5044_v31 = vpack.c.bf16 %v3873_v44, %v3872_v40  ;;  %v5052_v45 = vpack.c.bf16 %v3877_v54, %v3876_v8  ;;  %v5087_v44 = vpack.c.bf16 %v3927_v39, %v3926_v37  ;;  %v3840_v8 = vld [vmem:[%s6542_s3 + $0x150] sm:$0xff]  ;;  %v3913_v37 = vld [vmem:[%s6542_s3 + $0x398] sm:$0xff] }
 0x129   :  { %5033 = vmatpush3.bf16.msra.mxu0 %v5032_v33 }
 0x12a   :  { %4969 = vmatpush3.bf16.msra.mxu1 %v4968_v59  ;;  %5035 = vmatprep.subr.bf16.mxu0 %v5034_v15  ;;  %v5050_v59 = vpack.c.bf16 %v3893_v48, %v3892_v53  ;;  %v3850_v15 = vld [vmem:[%s6542_s3 + $0x1a0] sm:$0xff]  ;;  %v3857_v53 = vld [vmem:[%s6542_s3 + $0x1d8] sm:$0xff] }
 0x12b   :  { %4971 = vmatprep.subr.bf16.mxu1 %v4970_v7  ;;  %v5259_v7 = vmov 0.0|0.0  }
 0x12d   :  { %5037 = vmatpush3.bf16.msra.mxu0 %v5036_v17  ;;  %v3834_v17 = vld [vmem:[%s6542_s3 + $0x120] sm:$0xff] }
 0x12e   :  { %4973 = vmatpush3.bf16.msra.mxu1 %v4972_v58  ;;  %5039 = vmatprep.subr.bf16.mxu0 %v5038_v35  ;;  %v5000_v35 = vpack.c.bf16 %v3835_v3, %v3834_v17  ;;  %v5099_v3 = vpack.c.bf16 %v3935_v12, %v3934_v9  ;;  %v3903_v9 = vld [vmem:[%s6542_s3 + $0x348] sm:$0xff]  ;;  %v3944_v12 = vld [vmem:[%s6542_s3 + $0x490] sm:$0xff] }
 0x12f   :  { %4975 = vmatprep.subr.bf16.mxu1 %v4974_v60 }
 0x131   :  { %5041 = vmatpush3.bf16.msra.mxu0 %v5040_v36  ;;  %v3837_v36 = vld [vmem:[%s6542_s3 + $0x138] sm:$0xff] }
 0x132   :  { %4977 = vmatpush3.bf16.msra.mxu1 %v4976_v57  ;;  %5043 = vmatprep.subr.bf16.mxu0 %v5042_v43 }
 0x133   :  { %4979 = vmatprep.subr.bf16.mxu1 %v4978_v0  ;;  %v3830_v0 = vld [vmem:[%s6542_s3 + $0x100] sm:$0xff] }
 0x134   :  { %v4992_v21 = vpack.c.bf16 %v3831_v62, %v3830_v0  ;;  %v3932_v0 = vld [vmem:[%s6542_s3 + $0x430] sm:$0xff]  ;;  %v3933_v62 = vld [vmem:[%s6542_s3 + $0x438] sm:$0xff] }
 0x135   :  { %5045 = vmatpush3.bf16.msra.mxu0 %v5044_v31  ;;  %v3838_v31 = vld [vmem:[%s6542_s3 + $0x140] sm:$0xff] }
 0x136   :  { %4981 = vmatpush3.bf16.msra.mxu1 %v4980_v13  ;;  %5047 = vmatprep.subr.bf16.mxu0 %v5046_v42  ;;  %v3848_v13 = vld [vmem:[%s6542_s3 + $0x190] sm:$0xff]  ;;  %v3839_v42 = vld [vmem:[%s6542_s3 + $0x148] sm:$0xff] }
 0x137   :  { %4983 = vmatprep.subr.bf16.mxu1 %v4982_v4  ;;  %v4994_v5 = vpack.c.bf16 %v3849_v1, %v3848_v13  ;;  %v5008_v48 = vpack.c.bf16 %v3839_v42, %v3838_v31  ;;  %v3861_v13 = vld [vmem:[%s6542_s3 + $0x1f8] sm:$0xff]  ;;  %v3939_v42 = vld [vmem:[%s6542_s3 + $0x468] sm:$0xff] }
 0x139   :  { %5049 = vmatpush3.bf16.msra.mxu0 %v5048_v52  ;;  %v3856_v52 = vld [vmem:[%s6542_s3 + $0x1d0] sm:$0xff] }
 0x13a   :  { %4985 = vmatpush3.bf16.msra.mxu1 %v4984_v16  ;;  %5051 = vmatprep.subr.bf16.mxu0 %v5050_v59  ;;  %v3851_v16 = vld [vmem:[%s6542_s3 + $0x1a8] sm:$0xff]  ;;  %v5090_v59 = vpack.c.bf16 %v3929_v10, %v3928_v49  ;;  %v5010_v54 = vpack.c.bf16 %v3857_v53, %v3856_v52  ;;  %v3914_v52 = vld [vmem:[%s6542_s3 + $0x3a0] sm:$0xff] }
 0x13b   :  { %4987 = vmatprep.subr.bf16.mxu1 %v4986_v23  ;;  %v4998_v24 = vpack.c.bf16 %v3851_v16, %v3850_v15  ;;  %v3853_v23 = vld [vmem:[%s6542_s3 + $0x1b8] sm:$0xff]  ;;  %v3910_v15 = vld [vmem:[%s6542_s3 + $0x380] sm:$0xff]  ;;  %v3911_v16 = vld [vmem:[%s6542_s3 + $0x388] sm:$0xff] }
 0x13c   :  { %v5002_v32 = vpack.c.bf16 %v3853_v23, %v3852_v22  ;;  %v3915_v53 = vld [vmem:[%s6542_s3 + $0x3a8] sm:$0xff] }
 0x13d   :  { %5053 = vmatpush3.bf16.msra.mxu0 %v5052_v45  ;;  %v3841_v45 = vld [vmem:[%s6542_s3 + $0x158] sm:$0xff] }
 0x13e   :  { %4989 = vmatpush3.bf16.msra.mxu1 %v4988_v29  ;;  %5086 = vmatprep.subr.bf16.mxu0 %v5259_v7  ;;  %v3836_v29 = vld [vmem:[%s6542_s3 + $0x130] sm:$0xff] }
 0x13f   :  { %4991 = vmatprep.subr.bf16.mxu1 %v4990_v38  ;;  %v3854_v38 = vld [vmem:[%s6542_s3 + $0x1c0] sm:$0xff]  ;;  %v5004_v40 = vpack.c.bf16 %v3837_v36, %v3836_v29  ;;  %v3936_v29 = vld [vmem:[%s6542_s3 + $0x450] sm:$0xff] }
 0x140   :  { %v5006_v50 = vpack.c.bf16 %v3855_v41, %v3854_v38  ;;  %v3912_v36 = vld [vmem:[%s6542_s3 + $0x390] sm:$0xff] }
 0x141   :  { %v5058_v31 = vpack.c.bf16 %v3913_v37, %v3912_v36  ;;  %v3907_v36 = vld [vmem:[%s6542_s3 + $0x368] sm:$0xff]  ;;  %v3948_v37 = vld [vmem:[%s6542_s3 + $0x4b0] sm:$0xff] }
 0x17a   :  { %v169_v27 = vpop.f32.mrb[0].mxu1 }
 0x17b   :  { %v171_v56 = vpop.f32.mrb[1].mxu1 }
 0x18b   :  { %v311_v6 = vpop.f32.mrb[4].mxu1 }
 0x18c   :  { %v313_v25 = vpop.f32.mrb[5].mxu1 }
 0x19b   :  { %v6174_v33 = vpop.f32.mrb[8].mxu1 }
 0x19c   :  { %v6176_v58 = vpop.f32.mrb[9].mxu1 }
 0x1ce   :  { %v3473_v60 = vpop.f32.mrb[0].mxu0 }
 0x1cf   :  { %v5132_v61 = vadd.f32 %v3473_v60, %v169_v27  ;;  %v3475_v46 = vpop.f32.mrb[1].mxu0  ;;  %v3930_v27 = vld [vmem:[%s6542_s3 + $0x420] sm:$0xff]  ;;  %v5012_v60 = vpack.c.bf16 %v3841_v45, %v3840_v8  ;;  %v5062_v45 = vpack.c.bf16 %v3915_v53, %v3914_v52  ;;  %v3952_v52 = vld [vmem:[%s6542_s3 + $0x4d0] sm:$0xff]  ;;  %v3953_v53 = vld [vmem:[%s6542_s3 + $0x4d8] sm:$0xff] }
 0x1d0   :  { %v5133_v11 = vadd.f32 %v3475_v46, %v171_v56  ;;  %v3931_v56 = vld [vmem:[%s6542_s3 + $0x428] sm:$0xff]  ;;  %v3842_v46 = vld [vmem:[%s6542_s3 + $0x160] sm:$0xff] }
 0x1d1   :  { %v3778_v57 = vadd.f32 %v5132_v61, %v6178_v14  ;;  %v5093_v61 = vpack.c.bf16 %v3931_v56, %v3930_v27  ;;  %v3899_v27 = vld [vmem:[%s6542_s3 + $0x328] sm:$0xff]  ;;  %v3940_v56 = vld [vmem:[%s6542_s3 + $0x470] sm:$0xff] }
 0x1d2   :  { %v3779_v63 = vadd.f32 %v5133_v11, %v6178_v14 }
 0x1d3   :  { %v3788_v4 = vmax.f32 %v3778_v57, 0.0  ;;  %v3843_v57 = vld [vmem:[%s6542_s3 + $0x168] sm:$0xff] }
 0x1d4   :  { %v3789_v51 = vmax.f32 %v3779_v63, 0.0  ;;  %v3860_v63 = vld [vmem:[%s6542_s3 + $0x1f0] sm:$0xff]  ;;  %v5016_v1 = vpack.c.bf16 %v3843_v57, %v3842_v46 }
 0x1d6   :  { %4028 = vmatprep.mubr.f32.mxu1 %v3789_v51  ;;  %v5096_v51 = vpack.c.bf16 %v3933_v62, %v3932_v0  ;;  %v3901_v0 = vld [vmem:[%s6542_s3 + $0x338] sm:$0xff]  ;;  %v3942_v62 = vld [vmem:[%s6542_s3 + $0x480] sm:$0xff] }
 0x1d7   :  { %4029 = vmatmul.mubr.f32.vlgmr.msra.gmra.mrb[10].mxu1 %v3788_v4  ;;  %v5018_v4 = vpack.c.bf16 %v3861_v13, %v3860_v63  ;;  %v3943_v63 = vld [vmem:[%s6542_s3 + $0x488] sm:$0xff]  ;;  %v3918_v13 = vld [vmem:[%s6542_s3 + $0x3c0] sm:$0xff] }
 0x1d8   :  { %4993 = vmatpush3.bf16.msra.mxu1 %v4992_v21  ;;  %v3844_v21 = vld [vmem:[%s6542_s3 + $0x170] sm:$0xff] }
 0x1d9   :  { %4995 = vmatprep.subr.bf16.mxu1 %v4994_v5  ;;  %v3845_v5 = vld [vmem:[%s6542_s3 + $0x178] sm:$0xff] }
 0x1da   :  { %v3615_v18 = vpop.f32.mrb[2].mxu0  ;;  %v5020_v17 = vpack.c.bf16 %v3845_v5, %v3844_v21  ;;  %v5111_v21 = vpack.c.bf16 %v3943_v63, %v3942_v62 }
 0x1db   :  { %v5134_v19 = vadd.f32 %v3615_v18, %v311_v6  ;;  %v3617_v26 = vpop.f32.mrb[3].mxu0  ;;  %v3858_v6 = vld [vmem:[%s6542_s3 + $0x1e0] sm:$0xff] }
 0x1dc   :  { %v5135_v28 = vadd.f32 %v3617_v26, %v313_v25  ;;  %4997 = vmatpush3.bf16.msra.mxu1 %v4996_v20  ;;  %v3859_v25 = vld [vmem:[%s6542_s3 + $0x1e8] sm:$0xff]  ;;  %v3894_v18 = vld [vmem:[%s6542_s3 + $0x300] sm:$0xff] }
 0x1dd   :  { %v3782_v30 = vadd.f32 %v5134_v19, %v6178_v14  ;;  %4999 = vmatprep.subr.bf16.mxu1 %v4998_v24  ;;  %v5014_v11 = vpack.c.bf16 %v3859_v25, %v3858_v6  ;;  %v3941_v6 = vld [vmem:[%s6542_s3 + $0x478] sm:$0xff]  ;;  %v3916_v25 = vld [vmem:[%s6542_s3 + $0x3b0] sm:$0xff] }
 0x1de   :  { %v3783_v34 = vadd.f32 %v5135_v28, %v6178_v14  ;;  %v5054_v28 = vpack.c.bf16 %v3911_v16, %v3910_v15  ;;  %v5108_v46 = vpack.c.bf16 %v3941_v6, %v3940_v56  ;;  %v3945_v15 = vld [vmem:[%s6542_s3 + $0x498] sm:$0xff]  ;;  %v3920_v16 = vld [vmem:[%s6542_s3 + $0x3d0] sm:$0xff]  ;;  %v4346_v56 = vld [vmem:[%s6543_s4] sm:$0xff] }
 0x1df   :  { %v3792_v47 = vmax.f32 %v3782_v30, 0.0  ;;  %v3937_v30 = vld [vmem:[%s6542_s3 + $0x458] sm:$0xff] }
 0x1e0   :  { %v3793_v43 = vmax.f32 %v3783_v34, 0.0  ;;  %5001 = vmatpush3.bf16.msra.mxu1 %v5000_v35  ;;  %v3895_v35 = vld [vmem:[%s6542_s3 + $0x308] sm:$0xff] }
 0x1e1   :  { %5003 = vmatprep.subr.bf16.mxu1 %v5002_v32  ;;  %v5056_v41 = vpack.c.bf16 %v3895_v35, %v3894_v18  ;;  %v3923_v35 = vld [vmem:[%s6542_s3 + $0x3e8] sm:$0xff] }
 0x1e2   :  { %4168 = vmatprep.mubr.f32.mxu0 %v3793_v43  ;;  %v5102_v43 = vpack.c.bf16 %v3937_v30, %v3936_v29 }
 0x1e3   :  { %4169 = vmatmul.mubr.f32.vlgmr.msra.gmra.mrb[6].mxu0 %v3792_v47  ;;  %v3897_v47 = vld [vmem:[%s6542_s3 + $0x318] sm:$0xff] }
 0x1e4   :  { %5005 = vmatpush3.bf16.msra.mxu1 %v5004_v40  ;;  %5088 = vmatpush1.bf16.msra.mxu0 %v5087_v44 }
 0x1e5   :  { %5007 = vmatprep.subr.bf16.mxu1 %v5006_v50  ;;  %5089 = vmatprep.subr.bf16.mxu0 %v5259_v7  ;;  %v3938_v50 = vld [vmem:[%s6542_s3 + $0x460] sm:$0xff] }
 0x1e6   :  { %v5105_v8 = vpack.c.bf16 %v3939_v42, %v3938_v50  ;;  %v3951_v50 = vld [vmem:[%s6542_s3 + $0x4c8] sm:$0xff] }
 0x1e8   :  { %5009 = vmatpush3.bf16.msra.mxu1 %v5008_v48  ;;  %5091 = vmatpush1.bf16.msra.mxu0 %v5090_v59 }
 0x1e9   :  { %5011 = vmatprep.subr.bf16.mxu1 %v5010_v54  ;;  %5092 = vmatprep.subr.bf16.mxu0 %v5259_v7  ;;  %v3898_v54 = vld [vmem:[%s6542_s3 + $0x320] sm:$0xff] }
 0x1ec   :  { %5013 = vmatpush3.bf16.msra.mxu1 %v5012_v60  ;;  %5094 = vmatpush1.bf16.msra.mxu0 %v5093_v61  ;;  %v3917_v60 = vld [vmem:[%s6542_s3 + $0x3b8] sm:$0xff]  ;;  %v5064_v61 = vpack.c.bf16 %v3899_v27, %v3898_v54 }
 0x1ed   :  { %5015 = vmatprep.subr.bf16.mxu1 %v5014_v11  ;;  %5095 = vmatprep.subr.bf16.mxu0 %v5259_v7  ;;  %v3900_v11 = vld [vmem:[%s6542_s3 + $0x330] sm:$0xff]  ;;  %v5066_v57 = vpack.c.bf16 %v3917_v60, %v3916_v25 }
 0x1f0   :  { %v3544_v20 = vpop.f32.mrb[2].mxu1  ;;  %v3757_v24 = vpop.f32.mrb[4].mxu0  ;;  %5017 = vmatpush3.bf16.msra.mxu1 %v5016_v1  ;;  %5097 = vmatpush1.bf16.msra.mxu0 %v5096_v51  ;;  %v3919_v1 = vld [vmem:[%s6542_s3 + $0x3c8] sm:$0xff]  ;;  %v5068_v51 = vpack.c.bf16 %v3901_v0, %v3900_v11 }
 0x1f1   :  { %v3780_v22 = vadd.f32 %v6178_v14, %v3544_v20  ;;  %v6318_v23 = vadd.f32 %v3757_v24, %v6174_v33  ;;  %v3546_v19 = vpop.f32.mrb[3].mxu1  ;;  %v3759_v26 = vpop.f32.mrb[5].mxu0  ;;  %5019 = vmatprep.subr.bf16.mxu1 %v5018_v4  ;;  %5098 = vmatprep.subr.bf16.mxu0 %v5259_v7  ;;  %v3902_v4 = vld [vmem:[%s6542_s3 + $0x340] sm:$0xff]  ;;  %v5070_v5 = vpack.c.bf16 %v3919_v1, %v3918_v13  ;;  %v3921_v20 = vld [vmem:[%s6542_s3 + $0x3d8] sm:$0xff] }
 0x1f2   :  { %v3781_v33 = vadd.f32 %v6178_v14, %v3546_v19  ;;  %v5137_v32 = vadd.f32 %v3759_v26, %v6176_v58  ;;  %v3896_v58 = vld [vmem:[%s6542_s3 + $0x310] sm:$0xff]  ;;  %v5072_v24 = vpack.c.bf16 %v3903_v9, %v3902_v4  ;;  %v5074_v18 = vpack.c.bf16 %v3921_v20, %v3920_v16  ;;  %v3946_v19 = vld [vmem:[%s6542_s3 + $0x4a0] sm:$0xff]  ;;  %v3947_v26 = vld [vmem:[%s6542_s3 + $0x4a8] sm:$0xff] }
 0x1f3   :  { %v3790_v40 = vmax.f32 %v3780_v22, 0.0  ;;  %v5060_v59 = vpack.c.bf16 %v3897_v47, %v3896_v58  ;;  %v3905_v22 = vld [vmem:[%s6542_s3 + $0x358] sm:$0xff]  ;;  %v5117_v30 = vpack.c.bf16 %v3947_v26, %v3946_v19  ;;  %v3950_v47 = vld [vmem:[%s6542_s3 + $0x4c0] sm:$0xff] }
 0x1f4   :  { %v3791_v39 = vmax.f32 %v3781_v33, 0.0  ;;  %v3787_v34 = vadd.f32 %v5137_v32, %v6178_v14  ;;  %v6339_v38 = vpop.f32.mrb[6].mxu1  ;;  %5021 = vmatpush3.bf16.msra.mxu1 %v5020_v17  ;;  %5100 = vmatpush1.bf16.msra.mxu0 %v5099_v3  ;;  %v5114_v17 = vpack.c.bf16 %v3945_v15, %v3944_v12  ;;  %v3904_v3 = vld [vmem:[%s6542_s3 + $0x350] sm:$0xff]  ;;  %v3906_v33 = vld [vmem:[%s6542_s3 + $0x360] sm:$0xff] }
 0x1f5   :  { %v3688_v44 = vpop.f32.mrb[7].mxu1  ;;  %5055 = vmatprep.subr.bf16.mxu1 %v5054_v28  ;;  %5101 = vmatprep.subr.bf16.mxu0 %v5259_v7  ;;  %v3922_v28 = vld [vmem:[%s6542_s3 + $0x3e0] sm:$0xff]  ;;  %v5076_v29 = vpack.c.bf16 %v3905_v22, %v3904_v3 }
 0x1f6   :  { %v3797_v49 = vmax.f32 %v3787_v34, 0.0  ;;  %v3785_v10 = vadd.f32 %v6178_v14, %v3688_v44  ;;  %4098 = vmatprep.mubr.f32.mxu1 %v3791_v39  ;;  %v5078_v32 = vpack.c.bf16 %v3923_v35, %v3922_v28  ;;  %v3949_v39 = vld [vmem:[%s6542_s3 + $0x4b8] sm:$0xff]  ;;  %v3924_v34 = vld [vmem:[%s6542_s3 + $0x3f0] sm:$0xff]  ;;  %v4801_v9 = vld [vmem:[%s6545_s5] ss:$0 sm:$0xff]  ;;  %s5268_s5 = smov 3  }
 0x1f7   :  { %4099 = vmatmul.mubr.f32.vlgmr.msra.gmra.mrb[12].mxu1 %v3790_v40  ;;  %v5120_v58 = vpack.c.bf16 %v3949_v39, %v3948_v37  ;;  %v3908_v40 = vld [vmem:[%s6542_s3 + $0x370] sm:$0xff]  ;;  %v5262_v35 = vmov 683565275  }
 0x1f8   :  { %v3795_v48 = vmax.f32 %v3785_v10, 0.0  ;;  %5057 = vmatpush3.bf16.msra.mxu1 %v5056_v41  ;;  %5103 = vmatpush1.bf16.msra.mxu0 %v5102_v43  ;;  %v3925_v41 = vld [vmem:[%s6542_s3 + $0x3f8] sm:$0xff]  ;;  %v5080_v43 = vpack.c.bf16 %v3907_v36, %v3906_v33  ;;  %v3784_v10 = vadd.f32 %v6178_v14, %v6339_v38  ;;  %v3954_v38 = vld [vmem:[%s6542_s3 + $0x4e0] sm:$0xff]  ;;  %v5264_v36 = vmov 2131351028  }
 0x1f9   :  { %4800 = vmatprep.mubr.msk.f32.mxu0 %vm3956_vm10, %v3797_v49  ;;  %5059 = vmatprep.subr.bf16.mxu1 %v5058_v31  ;;  %v5082_v44 = vpack.c.bf16 %v3925_v41, %v3924_v34  ;;  %v3909_v31 = vld [vmem:[%s6542_s3 + $0x378] sm:$0xff]  ;;  %v5123_v49 = vpack.c.bf16 %v3951_v50, %v3950_v47  ;;  %v5265_v34 = vmov 2102212464  }
 0x1fa   :  { %4238 = vmatprep.mubr.f32.mxu1 %v3795_v48  ;;  %5104 = vmatprep.subr.bf16.mxu0 %v5259_v7  ;;  %v5084_v42 = vpack.c.bf16 %v3909_v31, %v3908_v40  ;;  %v5126_v48 = vpack.c.bf16 %v3953_v53, %v3952_v52  ;;  %v5267_v31 = vmov 1326507024  }
 0x1fc   :  { %5061 = vmatpush3.bf16.msra.mxu1 %v5060_v59  ;;  %5106 = vmatpush1.bf16.msra.mxu0 %v5105_v8  ;;  %v3794_v59 = vmax.f32 %v3784_v10, 0.0  ;;  %v3955_v8 = vld [vmem:[%s6542_s3 + $0x4e8] sm:$0x3] }
 0x1fd   :  { %5063 = vmatprep.subr.bf16.mxu1 %v5062_v45  ;;  %5107 = vmatprep.subr.bf16.mxu0 %v5259_v7  ;;  %v5129_v54 = vpack.c.bf16 %v3955_v8, %v3954_v38  ;;  %v3786_v45 = vadd.f32 %v6318_v23, %v6178_v14 }
 0x1ff   :  { %v3796_v27 = vmax.f32 %v3786_v45, 0.0 }
 0x200   :  { %5065 = vmatpush3.bf16.msra.mxu1 %v5064_v61  ;;  %5109 = vmatpush1.bf16.msra.mxu0 %v5108_v46 }
 0x201   :  { %5067 = vmatprep.subr.bf16.mxu1 %v5066_v57  ;;  %5110 = vmatprep.subr.bf16.mxu0 %v5259_v7 }
 0x204   :  { %5069 = vmatpush3.bf16.msra.mxu1 %v5068_v51  ;;  %5112 = vmatpush1.bf16.msra.mxu0 %v5111_v21 }
 0x205   :  { %5071 = vmatprep.subr.bf16.mxu1 %v5070_v5  ;;  %5113 = vmatprep.subr.bf16.mxu0 %v5259_v7 }
 0x208   :  { %5073 = vmatpush3.bf16.msra.mxu1 %v5072_v24  ;;  %5115 = vmatpush1.bf16.msra.mxu0 %v5114_v17 }
 0x209   :  { %5075 = vmatprep.subr.bf16.mxu1 %v5074_v18  ;;  %5116 = vmatprep.subr.bf16.mxu0 %v5259_v7 }
 0x20c   :  { %5077 = vmatpush3.bf16.msra.mxu1 %v5076_v29  ;;  %5118 = vmatpush1.bf16.msra.mxu0 %v5117_v30  ;;  %v5263_v30 = vmov 2475754826  }
 0x20d   :  { %5079 = vmatprep.subr.bf16.mxu1 %v5078_v32  ;;  %5119 = vmatprep.subr.bf16.mxu0 %v5259_v7 }
 0x210   :  { %5081 = vmatpush3.bf16.msra.mxu1 %v5080_v43  ;;  %5121 = vmatpush1.bf16.msra.mxu0 %v5120_v58  ;;  %v5266_v58 = vmov 920167782  }
 0x211   :  { %5083 = vmatprep.subr.bf16.mxu1 %v5082_v44  ;;  %5122 = vmatprep.subr.bf16.mxu0 %v5259_v7 }
 0x214   :  { %5085 = vmatpush3.bf16.msra.mxu1 %v5084_v42  ;;  %5124 = vmatpush1.bf16.msra.mxu0 %v5123_v49 }
 0x215   :  { %5125 = vmatprep.subr.bf16.mxu0 %v5259_v7  ;;  %4953 = vmatprep.subr.mxu1 %v5249_v2 }
 0x217   :  { %4239 = vmatmul.mubr.f32.vlgmr.msra.gmra.mrb[14].mxu1 %v3794_v59 }
 0x218   :  { %5127 = vmatpush1.bf16.msra.mxu0 %v5126_v48  ;;  %4955 = vmatprep.mubr.msk.f32.mxu1 %vm5261_vm14, %v5249_v2 }
 0x219   :  { %5128 = vmatprep.subr.bf16.mxu0 %v5259_v7  ;;  %4954 = vmatpush3.msra.mxu1 %v4346_v56 }
 0x21c   :  { %5131 = vmatpush1.bf16.msk.msra.mxu0 %vm5130_vm13, %v5129_v54 }
 0x21f   :  { %4309 = vmatmul.mubr.f32.vlgmr.msra.gmra.mrb[8].mxu0 %v3796_v27 }
 0x2aa   :  { %v4843_v6 = vpop.f32.mrb[10].mxu1 }
 0x2ab   :  { %v4844_v25 = vpop.f32.mrb[11].mxu1 }
 0x2ac   :  { %v4845_v60 = vadd.f32 %v4844_v25, %v4843_v6 }
 0x2b6   :  { %v4913_v61 = vpop.f32.mrb[6].mxu0 }
 0x2b7   :  { %v4914_v14 = vpop.f32.mrb[7].mxu0 }
 0x2b8   :  { %v4915_v23 = vadd.f32 %v4914_v14, %v4913_v61 }
 0x2ca   :  { %v4878_v7 = vpop.f32.mrb[12].mxu1 }
 0x2cb   :  { %v4879_v46 = vpop.f32.mrb[13].mxu1 }
 0x2cc   :  { %v4880_v11 = vadd.f32 %v4879_v46, %v4878_v7 }
 0x2ce   :  { %v4101_v57 = vadd.f32 %v4880_v11, %v4845_v60 }
 0x2d0   :  { %v4171_v0 = vadd.f32 %v4915_v23, %v4101_v57 }
 0x2ea   :  { %v4948_v62 = vpop.f32.mrb[14].mxu1 }
 0x2eb   :  { %v4949_v63 = vpop.f32.mrb[15].mxu1 }
 0x2ec   :  { %v4950_v13 = vadd.f32 %v4949_v63, %v4948_v62 }
 0x2ee   :  { %v4241_v1 = vadd.f32 %v4950_v13, %v4171_v0 }
 0x2f2   :  { %v4310_v51 = vpop.f32.mrb[8].mxu0 }
 0x2f3   :  { %v4311_v21 = vadd.f32 %v4310_v51, %v4241_v1  ;;  %v4312_v4 = vpop.f32.mrb[9].mxu0 }
 0x2f5   :  { %4314 = vxpose.xlu0.b32.start.end [1/1] (short) (narrow) %v4311_v21, 8 }
 0x31e   :  { %5239 = vset.pattern.permute.xlu0 %v5258_v55 }
 0x375   :  { %v4330_v5 = vpop.trf.xlu0 }
 0x376   :  { %4956 = vmatmul.mubr.msk.f32.vlgmr.msra.gmra.mrb[16].mxu1 %vm4354_vm15, %v4330_v5 }
 0x449   :  { %v4424_v12 = vpop.f32.mrb[16].mxu1 }
 0x44a   :  { %v6501_v15 = vadd.f32 %v4801_v9, %v4424_v12  ;;  %v4957_v16 = vpop.f32.mrb[17].mxu1 }
 0x44c   :  { %v4432_v20 = vand.u32 2139095040, %v6501_v15  ;;  %v4428_v55 = vmax.f32 %v6501_v15, 0.0  ;;  %v4429_v3 = vand.u32 2147483647, %v6501_v15  ;;  %vm4431_vm8 = vcmp.lt.s32.totalorder %v6501_v15, 0 }
 0x44e   :  { %v4433_v24 = vshrl.u32 %v4432_v20, 23  ;;  %4638 = vst.msk [vmem:[%s6544_s6] sm:$0xf] %vm4637_vm0, %v4428_v55  ;;  %v4436_v26 = vand.u32 8388607, %v4429_v3 }
 0x44f   :  { %vm4430_vm9 = vcmp.le.f32.partialorder %v4429_v3, 0.7853982 }
 0x450   :  { %v4803_v17 = vadd.s32 4294967169, %v4433_v24  ;;  %v4437_v50 = vor.u32 8388608, %v4436_v26 }
 0x452   :  { %v4439_v2 = vadd.s32 1, %v4803_v17  ;;  %v4477_v6 = vshll.u32 %v4437_v50, 8 }
 0x454   :  { %vm4440_vm1 = vcmp.gt.s32.totalorder %v4439_v2, 0 }
 0x455   :  { %v4441_v18 = vsel %vm4440_vm1, %v4439_v2, 0  ;;  %vm4521_vm1 = vweird.f32 %v6501_v15 }
 0x456   :  { %v4443_v22 = vand.u32 31, %v4441_v18  ;;  %v4442_v28 = vshrl.u32 %v4441_v18, 5 }
 0x458   :  { %v4444_v19 = vsub.s32 32, %v4443_v22  ;;  %v4446_v29 = vshll.u32 %v5262_v35, %v4443_v22  ;;  %v4449_v33 = vshll.u32 %v5263_v30, %v4443_v22  ;;  %v4452_v39 = vshll.u32 %v5264_v36, %v4443_v22 }
 0x459   :  { %v4455_v43 = vshll.u32 %v5265_v34, %v4443_v22  ;;  %v4458_v44 = vshll.u32 %v5266_v58, %v4443_v22  ;;  %vm4461_vm2 = vcmp.lt.s32.totalorder %v4442_v28, 1  ;;  %vm4464_vm3 = vcmp.lt.s32.totalorder %v4442_v28, 4 }
 0x45a   :  { %v4447_v32 = vshrl.u32 %v5263_v30, %v4444_v19  ;;  %v4450_v37 = vshrl.u32 %v5264_v36, %v4444_v19  ;;  %v4453_v41 = vshrl.u32 %v5265_v34, %v4444_v19  ;;  %v4456_v40 = vshrl.u32 %v5266_v58, %v4444_v19 }
 0x45b   :  { %v4459_v47 = vshrl.u32 %v5267_v31, %v4444_v19  ;;  %v4445_v8 = vshrl.u32 %v5262_v35, %v4444_v19  ;;  %vm4463_vm4 = vcmp.lt.s32.totalorder %v4442_v28, 3  ;;  %vm4462_vm5 = vcmp.lt.s32.totalorder %v4442_v28, 2 }
 0x45c   :  { %v4448_v42 = vor.u32 %v4447_v32, %v4446_v29  ;;  %v4451_v49 = vor.u32 %v4450_v37, %v4449_v33  ;;  %v4454_v10 = vor.u32 %v4453_v41, %v4452_v39  ;;  %v4457_v52 = vor.u32 %v4456_v40, %v4455_v43 }
 0x45d   :  { %v4460_v53 = vor.u32 %v4459_v47, %v4458_v44 }
 0x45e   :  { %v4466_v48 = vsel %vm4464_vm3, %v4454_v10, 2102212464  ;;  %v4469_v59 = vsel %vm4461_vm2, %v4448_v42, %v4451_v49  ;;  %v4473_v38 = vsel %vm4461_vm2, %v4451_v49, %v4454_v10  ;;  %v4470_v54 = vsel %vm4464_vm3, %v4457_v52, 920167782 }
 0x45f   :  { %v4474_v45 = vsel %vm4464_vm3, %v4460_v53, 1326507024  ;;  %v4471_v27 = vsel %vm4463_vm4, %v4454_v10, %v4470_v54  ;;  %v4465_v25 = vsel %vm4461_vm2, %v4445_v8, %v4448_v42  ;;  %v4467_v60 = vsel %vm4463_vm4, %v4451_v49, %v4466_v48 }
 0x460   :  { %v4475_v56 = vsel %vm4463_vm4, %v4457_v52, %v4474_v45  ;;  %v4472_v61 = vsel %vm4462_vm5, %v4469_v59, %v4471_v27  ;;  %v4468_v57 = vsel %vm4462_vm5, %v4465_v25, %v4467_v60  ;;  %vm4646_vm2 = vcmask 273672  }
 0x461   :  { %v4476_v14 = vsel %vm4462_vm5, %v4473_v38, %v4475_v56  ;;  %v6514_v46 = vmul.u32.u64.low %v4477_v6, %v4472_v61  ;;  %v6515_v11 = vmul.u32.u64.high %v4477_v6, %v4472_v61, %v6514_v46  ;;  %v4484_v62 = vmul.u32 %v4477_v6, %v4468_v57 }
 0x462   :  { %v6511_v23 = vmul.u32.u64.low %v4477_v6, %v4476_v14  ;;  %v6512_v7 = vmul.u32.u64.high %v4477_v6, %v4476_v14, %v6511_v23  ;;  %vm4652_vm3 = vcmask 290072   ;;  %vm4658_vm4 = vcmask 298272  }
 0x463   :  { %v4487_v0 = vadd.s32 1, %v6515_v11 }
 0x464   :  { %vm4486_vm6 = vc.u32 %v6512_v7, %v6514_v46  ;;  %v4485_v55 = vadd.s32 %v6514_v46, %v6512_v7 }
 0x465   :  { %v4488_v63 = vsel %vm4486_vm6, %v4487_v0, %v6515_v11 }
 0x466   :  { %v4489_v13 = vadd.s32 %v4488_v63, %v4484_v62 }
 0x468   :  { %v4490_v1 = vadd.s32 536870912, %v4489_v13 }
 0x46a   :  { %v4491_v51 = vshrl.u32 %v4490_v1, 30 }
 0x46c   :  { %v4492_v21 = vshll.u32 %v4491_v51, 30  ;;  %v4515_v33 = vsub.s32 4, %v4491_v51 }
 0x46e   :  { %v4493_v4 = vsub.s32 %v4489_v13, %v4492_v21  ;;  %v4516_v37 = vsel %vm4431_vm8, %v4515_v33, %v4491_v51 }
 0x46f   :  { %v4518_v34 = vsel %vm4430_vm9, 0, %v4516_v37 }
 0x470   :  { %v4495_v5 = vsub.s32 0, %v4493_v4  ;;  %v4625_v41 = vadd.s32 3, %v4518_v34  ;;  %v4522_v58 = vand.u32 3, %v4518_v34 }
 0x472   :  { %v4804_v9 = vmin.u32 %v4495_v5, %v4493_v4  ;;  %v4626_v43 = vand.u32 3, %v4625_v41  ;;  %vm4527_vm11 = vcmp.eq.s32.totalorder %v4522_v58, 2  ;;  %vm4524_vm14 = vcmp.eq.s32.totalorder %v4522_v58, 0 }
 0x473   :  { %vm4523_vm0 = vcmp.lt.s32.totalorder %v4522_v58, 2 }
 0x474   :  { %v4497_v12 = vclz %v4804_v9  ;;  %vm4631_vm10 = vcmp.eq.s32.totalorder %v4626_v43, 2  ;;  %vm4628_vm13 = vcmp.eq.s32.totalorder %v4626_v43, 0  ;;  %vm4627_vm15 = vcmp.lt.s32.totalorder %v4626_v43, 2 }
 0x476   :  { %v4805_v16 = vadd.s32 4294967294, %v4497_v12 }
 0x478   :  { %vm4806_vm7 = vcmp.lt.s32.totalorder %v4805_v16, 0 }
 0x479   :  { %v4500_v20 = vsel %vm4806_vm7, 0, %v4805_v16 }
 0x47a   :  { %v4501_v24 = vsub.s32 32, %v4500_v20  ;;  %v4505_v17 = vsub.s32 4294967266, %v4500_v20  ;;  %v4502_v2 = vshll.u32 %v4493_v4, %v4500_v20 }
 0x47c   :  { %v4503_v18 = vshrl.u32 %v4485_v55, %v4501_v24  ;;  %v4506_v22 = vadd.s32 127, %v4505_v17 }
 0x47e   :  { %v4504_v19 = vor.u32 %v4503_v18, %v4502_v2  ;;  %v4507_v26 = vshll.u32 %v4506_v22, 23 }
 0x480   :  { %v4508_v28 = vor.u32 4788187, %v4507_v26  ;;  %v4511_v29 = vcvt.s32.f32 %v4504_v19 }
 0x482   :  { %v4509_v35 = vand.u32 2147483647, %v4508_v28 }
 0x484   :  { %v4512_v30 = vmul.f32 %v4511_v29, %v4509_v35 }
 0x486   :  { %v4513_v32 = vxor.u32 2147483648, %v4512_v30 }
 0x488   :  { %v4514_v36 = vsel %vm4431_vm8, %v4513_v32, %v4512_v30 }
 0x489   :  { %v4517_v39 = vsel %vm4430_vm9, %v6501_v15, %v4514_v36 }
 0x48a   :  { %5245 = vcosq.f32 %v4517_v39 }
 0x48b   :  { %5247 = vsinq.f32 %v4517_v39 }
 0x494   :  { %v5246_v40 = vpop.eup %5245 }
 0x495   :  { %v5248_v44 = vpop.eup %5247  ;;  %v4528_v31 = vxor.u32 2147483648, %v5246_v40 }
 0x496   :  { %v4525_v47 = vxor.u32 2147483648, %v5248_v44 }
 0x497   :  { %v4633_v50 = vsel %vm4631_vm10, %v4528_v31, %v5248_v44  ;;  %v4529_v3 = vsel %vm4527_vm11, %v4528_v31, %v5248_v44 }
 0x498   :  { %v4630_v42 = vsel %vm4628_vm13, %v5246_v40, %v4525_v47  ;;  %v4526_v49 = vsel %vm4524_vm14, %v5246_v40, %v4525_v47 }
 0x499   :  { %v4634_v10 = vsel %vm4627_vm15, %v4630_v42, %v4633_v50  ;;  %v4530_v52 = vsel %vm4523_vm0, %v4526_v49, %v4529_v3 }
 0x49a   :  { %v4635_v53 = vsel %vm4521_vm1, nan, %v4634_v10  ;;  %v4531_v48 = vsel %vm4521_vm1, nan, %v4530_v52 }
 0x49b   :  { %4649 = vrot.lane.b32.xlu1 %v4635_v53, %s5268_s5  ;;  %4640 = vst.msk [vmem:[%s6544_s6] sm:$0xf] %vm4639_vm12, %v4531_v48  ;;  %v4641_v59 = vsub.f32 0.0, %v4635_v53 }
 0x49f   :  { %4643 = vrot.lane.b32.xlu1 %v4641_v59, %s5269_s1 }
 0x4a3   :  { %4655 = vrot.lane.b32.xlu1 %v4531_v48, %s5270_s11 }
 0x50d   :  { %v4650_v38 = vpop.permute.xlu1 %4649 }
 0x511   :  { %v4644_v15 = vpop.permute.xlu1 %4643 }
 0x512   :  { %4647 = vst.msk [vmem:[%s6544_s6] sm:$0xf] %vm4646_vm2, %v4644_v15 }
 0x513   :  { %4653 = vst.msk [vmem:[%s6544_s6] sm:$0xf] %vm4652_vm3, %v4650_v38 }
 0x515   :  { %v4656_v8 = vpop.permute.xlu1 %4655 }
 0x516   :  { %4659 = vst.msk [vmem:[%s6544_s6] sm:$0xf] %vm4658_vm4, %v4656_v8 }

</bundles_post_ra>
